<compile_context>
chip_gen: v5e
topology: v5e:2x2
jax: 0.10.0
libtpu: 0.0.40
codegen_flags: <defaults>
</compile_context>

<pallas_src>
import functools

import jax
import jax.numpy as jnp
import numpy as np
from jax.experimental import pallas as pl
from jax.experimental.pallas import tpu as pltpu


def _encoder_gru_kernel(tok_ref, lens_ref, h0_ref,
                        embp_ref, whh0_ref, bias0_ref, bhhn0_ref,
                        wih1_ref, whh1_ref, bias1_ref, bhhn1_ref,
                        out_ref, hfin_ref):
    TB = tok_ref.shape[0]          # T * B
    B = lens_ref.shape[0]
    T = TB // B
    V = embp_ref.shape[0]
    H = whh0_ref.shape[0]
    G = 3 * H

    # ---- fused embedding lookup + layer-0 input projection (prologue) ----
    # one-hot rows are 0/1 (bf16-exact); emb_proj = embedding @ W_ih0 was
    # precomputed in the wrapper.  Single MXU matmul for all timesteps.
    tok = tok_ref[...]                                              # (T*B, 1) int32
    onehot = (tok == jax.lax.broadcasted_iota(jnp.int32, (TB, V), 1)
              ).astype(jnp.bfloat16)                                # (T*B, V)
    gi0_all = (jnp.dot(onehot, embp_ref[...].astype(jnp.bfloat16),
                       preferred_element_type=jnp.float32)
               + bias0_ref[...])                                    # (T*B, 3H) f32

    # bf16 MXU operands (f32 accumulation); gate math stays f32.
    whh0 = whh0_ref[...].astype(jnp.bfloat16)
    wih1 = wih1_ref[...].astype(jnp.bfloat16)
    whh1 = whh1_ref[...].astype(jnp.bfloat16)

    # ---- hoisted broadcasts (not CSE'd across unrolled steps otherwise) ----
    bias1_b = jnp.broadcast_to(bias1_ref[...], (B, G))              # (B, 3H)
    bhhn0_b = jnp.broadcast_to(bhhn0_ref[...], (B, H))              # (B, H)
    bhhn1_b = jnp.broadcast_to(bhhn1_ref[...], (B, H))              # (B, H)
    lens_bh = jnp.broadcast_to(lens_ref[...], (B, H))               # (B, H) int32

    h0 = h0_ref[0].astype(jnp.float32)                              # (B, H)
    h1 = h0_ref[1].astype(jnp.float32)                              # (B, H)

    def gates(gi, gh, bhh_n_b, h):
        # PyTorch GRUCell with r/z slices of b_hh pre-folded into gi.
        rz = jax.nn.sigmoid(gi[:, :2 * H] + gh[:, :2 * H])          # fused r/z sigmoid
        r, z = rz[:, :H], rz[:, H:]
        n = jnp.tanh(gi[:, 2 * H:] + r * (gh[:, 2 * H:] + bhh_n_b))
        return n + z * (h - n)                                      # == (1-z)*n + z*h

    # ---- time recurrence: fully unrolled, state stays in vregs ----
    # gh0 for step t+1 is issued right after the step-t h0 update so it can
    # overlap the (off-critical-path) layer-1 work of step t.
    gh0_next = jnp.dot(h0.astype(jnp.bfloat16), whh0,
                       preferred_element_type=jnp.float32)
    outs = []
    for t in range(T):
        valid = lens_bh > t                                         # (B, H) bool

        # --- layer 0: the serial critical path ---
        gi0 = gi0_all[t * B:(t + 1) * B, :]                         # precomputed (B, 3H)
        h0_new = gates(gi0, gh0_next, bhhn0_b, h0)
        h0 = jnp.where(valid, h0_new, h0)                           # packed-seq freeze
        if t + 1 < T:
            gh0_next = jnp.dot(h0.astype(jnp.bfloat16), whh0,
                               preferred_element_type=jnp.float32)

        # --- layer 1: off the recurrence-critical path ---
        gi1 = jnp.dot(h0_new.astype(jnp.bfloat16), wih1,
                      preferred_element_type=jnp.float32) + bias1_b
        gh1 = jnp.dot(h1.astype(jnp.bfloat16), whh1,
                      preferred_element_type=jnp.float32)
        h1_new = gates(gi1, gh1, bhhn1_b, h1)
        h1 = jnp.where(valid, h1_new, h1)
        outs.append(jnp.where(valid, h1_new, 0.0))                  # pad -> zeros

    # ---- aggregated stores: one wide lane-dense slab + one final-hidden ----
    out_ref[...] = jnp.concatenate(outs, axis=-1).astype(out_ref.dtype)   # (B, T*H)
    hfin_ref[...] = jnp.stack([h0, h1], axis=0).astype(hfin_ref.dtype)    # (2, B, H)


def encoder_rnn_forward(tokens, hidden, input_lengths, params):
    """tokens:(T,B) int32, hidden:(2,B,H) f32, input_lengths:(B,) int32."""
    T, B = tokens.shape
    H = hidden.shape[-1]

    # ---- parameter prep (constant-folded under jit) ----
    # Dropout(p=0) is the identity, so embedding and W_ih0 compose exactly.
    emb_proj = jnp.dot(params["embedding"], params["wih0"],
                       preferred_element_type=jnp.float32)           # (V, 3H)
    # Fold r/z slices of b_hh into the input-side biases; keep the n-gate
    # slice separate (it must stay inside r*(...) for PyTorch parity).
    bias0 = jnp.concatenate(
        [params["bih0"][:, :2 * H] + params["bhh0"][:, :2 * H],
         params["bih0"][:, 2 * H:]], axis=-1)                        # (1, 3H)
    bias1 = jnp.concatenate(
        [params["bih1"][:, :2 * H] + params["bhh1"][:, :2 * H],
         params["bih1"][:, 2 * H:]], axis=-1)                        # (1, 3H)
    bhhn0 = params["bhh0"][:, 2 * H:]                                # (1, H)
    bhhn1 = params["bhh1"][:, 2 * H:]                                # (1, H)

    # Tokens go in time-major flattened order so rows of the hoisted layer-0
    # projection line up with [t*B:(t+1)*B] slices.
    tok_flat = tokens.reshape(T * B, 1).astype(jnp.int32)
    lens_col = input_lengths.reshape(B, 1).astype(jnp.int32)

    vmem = pl.BlockSpec(memory_space=pltpu.MemorySpace.VMEM)

    out_lane_dense, h_final = pl.pallas_call(
        _encoder_gru_kernel,
        in_specs=[vmem] * 11,
        out_specs=(vmem, vmem),
        out_shape=(
            jax.ShapeDtypeStruct((B, T * H), jnp.float32),   # lane-dense output slab
            jax.ShapeDtypeStruct((2, B, H), jnp.float32),    # final hidden
        ),
    )(tok_flat, lens_col, hidden, emb_proj,
      params["whh0"], bias0, bhhn0,
      params["wih1"], params["whh1"], bias1, bhhn1)

    # (B, T*H) -> (T, B, H): pure layout plumbing on an 8 KiB array.
    output = out_lane_dense.reshape(B, T, H).transpose(1, 0, 2)
    return output, h_final


def _reference_forward(tokens, hidden, input_lengths, params):
    """Pure-JAX f32 reference for the packed 2-layer GRU (sanity check)."""
    T, B = tokens.shape
    H = hidden.shape[-1]
    x_emb = jnp.take(params["embedding"], tokens, axis=0)
    mask = (jnp.arange(T)[:, None] < input_lengths[None, :]).astype(jnp.float32)

    def cell(x, h, w_ih, w_hh, b_ih, b_hh):
        gi = jnp.dot(x, w_ih, preferred_element_type=jnp.float32) + b_ih
        gh = jnp.dot(h, w_hh, preferred_element_type=jnp.float32) + b_hh
        r = jax.nn.sigmoid(gi[:, :H] + gh[:, :H])
        z = jax.nn.sigmoid(gi[:, H:2 * H] + gh[:, H:2 * H])
        n = jnp.tanh(gi[:, 2 * H:] + r * gh[:, 2 * H:])
        return (1.0 - z) * n + z * h

    def step(carry, inp):
        h0, h1 = carry
        x_t, m_t = inp
        m = m_t[:, None]
        h0n = cell(x_t, h0, params["wih0"], params["whh0"],
                   params["bih0"], params["bhh0"])
        h1n = cell(h0n, h1, params["wih1"], params["whh1"],
                   params["bih1"], params["bhh1"])
        h0u = m * h0n + (1.0 - m) * h0
        h1u = m * h1n + (1.0 - m) * h1
        return (h0u, h1u), m * h1n

    (h0f, h1f), outs = jax.lax.scan(step, (hidden[0], hidden[1]), (x_emb, mask))
    return outs, jnp.stack([h0f, h1f], axis=0)


def make_params(key, vocab, E, H):
    ks = jax.random.split(key, 9)
    bound = 1.0 / np.sqrt(H)
    u = lambda k, shape: jax.random.uniform(k, shape, jnp.float32, -bound, bound)
    return {
        "embedding": jax.random.normal(ks[0], (vocab, E), jnp.float32),
        "wih0": u(ks[1], (E, 3 * H)),
        "whh0": u(ks[2], (H, 3 * H)),
        "bih0": u(ks[3], (1, 3 * H)),
        "bhh0": u(ks[4], (1, 3 * H)),
        "wih1": u(ks[5], (H, 3 * H)),
        "whh1": u(ks[6], (H, 3 * H)),
        "bih1": u(ks[7], (1, 3 * H)),
        "bhh1": u(ks[8], (1, 3 * H)),
    }


if __name__ == "__main__":
    # EncoderRNN('GRU', input_size=50, hidden_size=32, embedding_size=32,
    #            batch_size=8, n_layers=2, bidirectional=False, dropout_p=0)
    VOCAB, E, H = 50, 32, 32
    T, B = 8, 8

    key = jax.random.PRNGKey(0)
    kp, kt = jax.random.split(key)
    params = make_params(kp, VOCAB, E, H)

    tokens = jax.random.randint(kt, (T, B), 0, VOCAB, dtype=jnp.int32)
    input_lengths = jnp.array([8, 8, 7, 6, 5, 4, 3, 2], dtype=jnp.int32)  # sorted desc
    hidden = jnp.zeros((2, B, H), jnp.float32)  # init_hidden()

    fwd = jax.jit(functools.partial(encoder_rnn_forward, params=params))
    out, h_final = fwd(tokens, hidden, input_lengths)
    jax.block_until_ready((out, h_final))

    ref_out, ref_h = _reference_forward(tokens, hidden, input_lengths, params)
    # bf16 MXU operands (f32 accumulation) -> loosened tolerance vs f32 reference.
    np.testing.assert_allclose(np.asarray(out), np.asarray(ref_out),
                               rtol=3e-2, atol=3e-2)
    np.testing.assert_allclose(np.asarray(h_final), np.asarray(ref_h),
                               rtol=3e-2, atol=3e-2)

    print("KERNEL_OK")
</pallas_src>

<mosaic_0001>
module attributes {stable_mosaic.version = 11 : i64} {
  func.func @_encoder_gru_kernel(%arg0: memref<64x1xi32, #tpu.memory_space<vmem>>, %arg1: memref<8x1xi32, #tpu.memory_space<vmem>>, %arg2: memref<2x8x32xf32, #tpu.memory_space<vmem>>, %arg3: memref<50x96xf32, #tpu.memory_space<vmem>>, %arg4: memref<32x96xf32, #tpu.memory_space<vmem>>, %arg5: memref<1x96xf32, #tpu.memory_space<vmem>>, %arg6: memref<1x32xf32, #tpu.memory_space<vmem>>, %arg7: memref<32x96xf32, #tpu.memory_space<vmem>>, %arg8: memref<32x96xf32, #tpu.memory_space<vmem>>, %arg9: memref<1x96xf32, #tpu.memory_space<vmem>>, %arg10: memref<1x32xf32, #tpu.memory_space<vmem>>, %arg11: memref<8x256xf32, #tpu.memory_space<vmem>>, %arg12: memref<2x8x32xf32, #tpu.memory_space<vmem>>) attributes {dimension_semantics = [], scalar_prefetch = 0 : i64, scratch_operands = 0 : i64, tpu.core_type = #tpu.core_type<tc>} {
    %c0 = arith.constant 0 : index
    %c0_0 = arith.constant 0 : index
    %0 = vector.load %arg0[%c0, %c0_0] : memref<64x1xi32, #tpu.memory_space<vmem>>, vector<64x1xi32>
    %1 = tpu.iota {dimensions = array<i32: 1>} : vector<64x50xi32>
    %2 = vector.broadcast %0 : vector<64x1xi32> to vector<64x50xi32>
    %3 = arith.cmpi eq, %2, %1 : vector<64x50xi32>
    %4 = arith.extui %3 : vector<64x50xi1> to vector<64x50xi32>
    %5 = arith.sitofp %4 : vector<64x50xi32> to vector<64x50xf32>
    %6 = arith.truncf %5 : vector<64x50xf32> to vector<64x50xbf16>
    %c0_1 = arith.constant 0 : index
    %c0_2 = arith.constant 0 : index
    %7 = vector.load %arg3[%c0_1, %c0_2] : memref<50x96xf32, #tpu.memory_space<vmem>>, vector<50x96xf32>
    %8 = arith.truncf %7 : vector<50x96xf32> to vector<50x96xbf16>
    %cst = arith.constant dense<0.000000e+00> : vector<64x96xf32>
    %9 = tpu.matmul %6, %8, %cst {dimension_numbers = #tpu.dot_dimension_numbers<[1], [0], [0], [1], [0, 0, 1, 1], [], []>} : vector<64x50xbf16>, vector<50x96xbf16>, vector<64x96xf32> -> vector<64x96xf32>
    %c0_3 = arith.constant 0 : index
    %c0_4 = arith.constant 0 : index
    %10 = vector.load %arg5[%c0_3, %c0_4] : memref<1x96xf32, #tpu.memory_space<vmem>>, vector<1x96xf32>
    %11 = vector.broadcast %10 : vector<1x96xf32> to vector<64x96xf32>
    %12 = arith.addf %9, %11 : vector<64x96xf32>
    %c0_5 = arith.constant 0 : index
    %c0_6 = arith.constant 0 : index
    %13 = vector.load %arg4[%c0_5, %c0_6] : memref<32x96xf32, #tpu.memory_space<vmem>>, vector<32x96xf32>
    %14 = arith.truncf %13 : vector<32x96xf32> to vector<32x96xbf16>
    %c0_7 = arith.constant 0 : index
    %c0_8 = arith.constant 0 : index
    %15 = vector.load %arg7[%c0_7, %c0_8] : memref<32x96xf32, #tpu.memory_space<vmem>>, vector<32x96xf32>
    %16 = arith.truncf %15 : vector<32x96xf32> to vector<32x96xbf16>
    %c0_9 = arith.constant 0 : index
    %c0_10 = arith.constant 0 : index
    %17 = vector.load %arg8[%c0_9, %c0_10] : memref<32x96xf32, #tpu.memory_space<vmem>>, vector<32x96xf32>
    %18 = arith.truncf %17 : vector<32x96xf32> to vector<32x96xbf16>
    %c0_11 = arith.constant 0 : index
    %c0_12 = arith.constant 0 : index
    %19 = vector.load %arg9[%c0_11, %c0_12] : memref<1x96xf32, #tpu.memory_space<vmem>>, vector<1x96xf32>
    %20 = vector.shape_cast %19 : vector<1x96xf32> to vector<1x96xf32>
    %21 = vector.broadcast %20 : vector<1x96xf32> to vector<8x96xf32>
    %c0_13 = arith.constant 0 : index
    %c0_14 = arith.constant 0 : index
    %22 = vector.load %arg6[%c0_13, %c0_14] : memref<1x32xf32, #tpu.memory_space<vmem>>, vector<1x32xf32>
    %23 = vector.shape_cast %22 : vector<1x32xf32> to vector<1x32xf32>
    %24 = vector.broadcast %23 : vector<1x32xf32> to vector<8x32xf32>
    %c0_15 = arith.constant 0 : index
    %c0_16 = arith.constant 0 : index
    %25 = vector.load %arg10[%c0_15, %c0_16] : memref<1x32xf32, #tpu.memory_space<vmem>>, vector<1x32xf32>
    %26 = vector.shape_cast %25 : vector<1x32xf32> to vector<1x32xf32>
    %27 = vector.broadcast %26 : vector<1x32xf32> to vector<8x32xf32>
    %c0_17 = arith.constant 0 : index
    %c0_18 = arith.constant 0 : index
    %28 = vector.load %arg1[%c0_17, %c0_18] : memref<8x1xi32, #tpu.memory_space<vmem>>, vector<8x1xi32>
    %29 = vector.shape_cast %28 : vector<8x1xi32> to vector<8x1xi32>
    %30 = vector.broadcast %29 : vector<8x1xi32> to vector<8x32xi32>
    %c0_19 = arith.constant 0 : index
    %c0_20 = arith.constant 0 : index
    %c0_21 = arith.constant 0 : index
    %31 = vector.load %arg2[%c0_19, %c0_20, %c0_21] : memref<2x8x32xf32, #tpu.memory_space<vmem>>, vector<1x8x32xf32>
    %32 = vector.shape_cast %31 : vector<1x8x32xf32> to vector<8x32xf32>
    %c1 = arith.constant 1 : index
    %c0_22 = arith.constant 0 : index
    %c0_23 = arith.constant 0 : index
    %33 = vector.load %arg2[%c1, %c0_22, %c0_23] : memref<2x8x32xf32, #tpu.memory_space<vmem>>, vector<1x8x32xf32>
    %34 = vector.shape_cast %33 : vector<1x8x32xf32> to vector<8x32xf32>
    %35 = arith.truncf %32 : vector<8x32xf32> to vector<8x32xbf16>
    %cst_24 = arith.constant dense<0.000000e+00> : vector<8x96xf32>
    %36 = tpu.matmul %35, %14, %cst_24 {dimension_numbers = #tpu.dot_dimension_numbers<[1], [0], [0], [1], [0, 0, 1, 1], [], []>} : vector<8x32xbf16>, vector<32x96xbf16>, vector<8x96xf32> -> vector<8x96xf32>
    %c0_i32 = arith.constant 0 : i32
    %37 = vector.broadcast %c0_i32 : i32 to vector<8x32xi32>
    %38 = arith.cmpi sgt, %30, %37 : vector<8x32xi32>
    %39 = vector.extract_strided_slice %12 {offsets = [0, 0], sizes = [8, 96], strides = [1, 1]} : vector<64x96xf32> to vector<8x96xf32>
    %40 = vector.extract_strided_slice %39 {offsets = [0, 0], sizes = [8, 64], strides = [1, 1]} : vector<8x96xf32> to vector<8x64xf32>
    %41 = vector.extract_strided_slice %36 {offsets = [0, 0], sizes = [8, 64], strides = [1, 1]} : vector<8x96xf32> to vector<8x64xf32>
    %42 = arith.addf %40, %41 : vector<8x64xf32>
    %43 = arith.negf %42 : vector<8x64xf32>
    %44 = math.exp %43 : vector<8x64xf32>
    %cst_25 = arith.constant 1.000000e+00 : f32
    %45 = vector.broadcast %cst_25 : f32 to vector<8x64xf32>
    %46 = arith.addf %45, %44 : vector<8x64xf32>
    %47 = arith.divf %45, %46 : vector<8x64xf32>
    %48 = vector.extract_strided_slice %47 {offsets = [0, 0], sizes = [8, 32], strides = [1, 1]} : vector<8x64xf32> to vector<8x32xf32>
    %49 = vector.extract_strided_slice %47 {offsets = [0, 32], sizes = [8, 32], strides = [1, 1]} : vector<8x64xf32> to vector<8x32xf32>
    %50 = vector.extract_strided_slice %39 {offsets = [0, 64], sizes = [8, 32], strides = [1, 1]} : vector<8x96xf32> to vector<8x32xf32>
    %51 = vector.extract_strided_slice %36 {offsets = [0, 64], sizes = [8, 32], strides = [1, 1]} : vector<8x96xf32> to vector<8x32xf32>
    %52 = arith.addf %51, %24 : vector<8x32xf32>
    %53 = arith.mulf %48, %52 : vector<8x32xf32>
    %54 = arith.addf %50, %53 : vector<8x32xf32>
    %55 = math.tanh %54 : vector<8x32xf32>
    %56 = arith.subf %32, %55 : vector<8x32xf32>
    %57 = arith.mulf %49, %56 : vector<8x32xf32>
    %58 = arith.addf %55, %57 : vector<8x32xf32>
    %59 = arith.select %38, %58, %32 : vector<8x32xi1>, vector<8x32xf32>
    %60 = arith.truncf %59 : vector<8x32xf32> to vector<8x32xbf16>
    %cst_26 = arith.constant dense<0.000000e+00> : vector<8x96xf32>
    %61 = tpu.matmul %60, %14, %cst_26 {dimension_numbers = #tpu.dot_dimension_numbers<[1], [0], [0], [1], [0, 0, 1, 1], [], []>} : vector<8x32xbf16>, vector<32x96xbf16>, vector<8x96xf32> -> vector<8x96xf32>
    %62 = arith.truncf %58 : vector<8x32xf32> to vector<8x32xbf16>
    %cst_27 = arith.constant dense<0.000000e+00> : vector<8x96xf32>
    %63 = tpu.matmul %62, %16, %cst_27 {dimension_numbers = #tpu.dot_dimension_numbers<[1], [0], [0], [1], [0, 0, 1, 1], [], []>} : vector<8x32xbf16>, vector<32x96xbf16>, vector<8x96xf32> -> vector<8x96xf32>
    %64 = arith.addf %63, %21 : vector<8x96xf32>
    %65 = arith.truncf %34 : vector<8x32xf32> to vector<8x32xbf16>
    %cst_28 = arith.constant dense<0.000000e+00> : vector<8x96xf32>
    %66 = tpu.matmul %65, %18, %cst_28 {dimension_numbers = #tpu.dot_dimension_numbers<[1], [0], [0], [1], [0, 0, 1, 1], [], []>} : vector<8x32xbf16>, vector<32x96xbf16>, vector<8x96xf32> -> vector<8x96xf32>
    %67 = vector.extract_strided_slice %64 {offsets = [0, 0], sizes = [8, 64], strides = [1, 1]} : vector<8x96xf32> to vector<8x64xf32>
    %68 = vector.extract_strided_slice %66 {offsets = [0, 0], sizes = [8, 64], strides = [1, 1]} : vector<8x96xf32> to vector<8x64xf32>
    %69 = arith.addf %67, %68 : vector<8x64xf32>
    %70 = arith.negf %69 : vector<8x64xf32>
    %71 = math.exp %70 : vector<8x64xf32>
    %cst_29 = arith.constant 1.000000e+00 : f32
    %72 = vector.broadcast %cst_29 : f32 to vector<8x64xf32>
    %73 = arith.addf %72, %71 : vector<8x64xf32>
    %74 = arith.divf %72, %73 : vector<8x64xf32>
    %75 = vector.extract_strided_slice %74 {offsets = [0, 0], sizes = [8, 32], strides = [1, 1]} : vector<8x64xf32> to vector<8x32xf32>
    %76 = vector.extract_strided_slice %74 {offsets = [0, 32], sizes = [8, 32], strides = [1, 1]} : vector<8x64xf32> to vector<8x32xf32>
    %77 = vector.extract_strided_slice %64 {offsets = [0, 64], sizes = [8, 32], strides = [1, 1]} : vector<8x96xf32> to vector<8x32xf32>
    %78 = vector.extract_strided_slice %66 {offsets = [0, 64], sizes = [8, 32], strides = [1, 1]} : vector<8x96xf32> to vector<8x32xf32>
    %79 = arith.addf %78, %27 : vector<8x32xf32>
    %80 = arith.mulf %75, %79 : vector<8x32xf32>
    %81 = arith.addf %77, %80 : vector<8x32xf32>
    %82 = math.tanh %81 : vector<8x32xf32>
    %83 = arith.subf %34, %82 : vector<8x32xf32>
    %84 = arith.mulf %76, %83 : vector<8x32xf32>
    %85 = arith.addf %82, %84 : vector<8x32xf32>
    %86 = arith.select %38, %85, %34 : vector<8x32xi1>, vector<8x32xf32>
    %cst_30 = arith.constant 0.000000e+00 : f32
    %87 = vector.broadcast %cst_30 : f32 to vector<8x32xf32>
    %88 = arith.select %38, %85, %87 : vector<8x32xi1>, vector<8x32xf32>
    %c1_i32 = arith.constant 1 : i32
    %89 = vector.broadcast %c1_i32 : i32 to vector<8x32xi32>
    %90 = arith.cmpi sgt, %30, %89 : vector<8x32xi32>
    %91 = vector.extract_strided_slice %12 {offsets = [8, 0], sizes = [8, 96], strides = [1, 1]} : vector<64x96xf32> to vector<8x96xf32>
    %92 = vector.extract_strided_slice %91 {offsets = [0, 0], sizes = [8, 64], strides = [1, 1]} : vector<8x96xf32> to vector<8x64xf32>
    %93 = vector.extract_strided_slice %61 {offsets = [0, 0], sizes = [8, 64], strides = [1, 1]} : vector<8x96xf32> to vector<8x64xf32>
    %94 = arith.addf %92, %93 : vector<8x64xf32>
    %95 = arith.negf %94 : vector<8x64xf32>
    %96 = math.exp %95 : vector<8x64xf32>
    %cst_31 = arith.constant 1.000000e+00 : f32
    %97 = vector.broadcast %cst_31 : f32 to vector<8x64xf32>
    %98 = arith.addf %97, %96 : vector<8x64xf32>
    %99 = arith.divf %97, %98 : vector<8x64xf32>
    %100 = vector.extract_strided_slice %99 {offsets = [0, 0], sizes = [8, 32], strides = [1, 1]} : vector<8x64xf32> to vector<8x32xf32>
    %101 = vector.extract_strided_slice %99 {offsets = [0, 32], sizes = [8, 32], strides = [1, 1]} : vector<8x64xf32> to vector<8x32xf32>
    %102 = vector.extract_strided_slice %91 {offsets = [0, 64], sizes = [8, 32], strides = [1, 1]} : vector<8x96xf32> to vector<8x32xf32>
    %103 = vector.extract_strided_slice %61 {offsets = [0, 64], sizes = [8, 32], strides = [1, 1]} : vector<8x96xf32> to vector<8x32xf32>
    %104 = arith.addf %103, %24 : vector<8x32xf32>
    %105 = arith.mulf %100, %104 : vector<8x32xf32>
    %106 = arith.addf %102, %105 : vector<8x32xf32>
    %107 = math.tanh %106 : vector<8x32xf32>
    %108 = arith.subf %59, %107 : vector<8x32xf32>
    %109 = arith.mulf %101, %108 : vector<8x32xf32>
    %110 = arith.addf %107, %109 : vector<8x32xf32>
    %111 = arith.select %90, %110, %59 : vector<8x32xi1>, vector<8x32xf32>
    %112 = arith.truncf %111 : vector<8x32xf32> to vector<8x32xbf16>
    %cst_32 = arith.constant dense<0.000000e+00> : vector<8x96xf32>
    %113 = tpu.matmul %112, %14, %cst_32 {dimension_numbers = #tpu.dot_dimension_numbers<[1], [0], [0], [1], [0, 0, 1, 1], [], []>} : vector<8x32xbf16>, vector<32x96xbf16>, vector<8x96xf32> -> vector<8x96xf32>
    %114 = arith.truncf %110 : vector<8x32xf32> to vector<8x32xbf16>
    %cst_33 = arith.constant dense<0.000000e+00> : vector<8x96xf32>
    %115 = tpu.matmul %114, %16, %cst_33 {dimension_numbers = #tpu.dot_dimension_numbers<[1], [0], [0], [1], [0, 0, 1, 1], [], []>} : vector<8x32xbf16>, vector<32x96xbf16>, vector<8x96xf32> -> vector<8x96xf32>
    %116 = arith.addf %115, %21 : vector<8x96xf32>
    %117 = arith.truncf %86 : vector<8x32xf32> to vector<8x32xbf16>
    %cst_34 = arith.constant dense<0.000000e+00> : vector<8x96xf32>
    %118 = tpu.matmul %117, %18, %cst_34 {dimension_numbers = #tpu.dot_dimension_numbers<[1], [0], [0], [1], [0, 0, 1, 1], [], []>} : vector<8x32xbf16>, vector<32x96xbf16>, vector<8x96xf32> -> vector<8x96xf32>
    %119 = vector.extract_strided_slice %116 {offsets = [0, 0], sizes = [8, 64], strides = [1, 1]} : vector<8x96xf32> to vector<8x64xf32>
    %120 = vector.extract_strided_slice %118 {offsets = [0, 0], sizes = [8, 64], strides = [1, 1]} : vector<8x96xf32> to vector<8x64xf32>
    %121 = arith.addf %119, %120 : vector<8x64xf32>
    %122 = arith.negf %121 : vector<8x64xf32>
    %123 = math.exp %122 : vector<8x64xf32>
    %cst_35 = arith.constant 1.000000e+00 : f32
    %124 = vector.broadcast %cst_35 : f32 to vector<8x64xf32>
    %125 = arith.addf %124, %123 : vector<8x64xf32>
    %126 = arith.divf %124, %125 : vector<8x64xf32>
    %127 = vector.extract_strided_slice %126 {offsets = [0, 0], sizes = [8, 32], strides = [1, 1]} : vector<8x64xf32> to vector<8x32xf32>
    %128 = vector.extract_strided_slice %126 {offsets = [0, 32], sizes = [8, 32], strides = [1, 1]} : vector<8x64xf32> to vector<8x32xf32>
    %129 = vector.extract_strided_slice %116 {offsets = [0, 64], sizes = [8, 32], strides = [1, 1]} : vector<8x96xf32> to vector<8x32xf32>
    %130 = vector.extract_strided_slice %118 {offsets = [0, 64], sizes = [8, 32], strides = [1, 1]} : vector<8x96xf32> to vector<8x32xf32>
    %131 = arith.addf %130, %27 : vector<8x32xf32>
    %132 = arith.mulf %127, %131 : vector<8x32xf32>
    %133 = arith.addf %129, %132 : vector<8x32xf32>
    %134 = math.tanh %133 : vector<8x32xf32>
    %135 = arith.subf %86, %134 : vector<8x32xf32>
    %136 = arith.mulf %128, %135 : vector<8x32xf32>
    %137 = arith.addf %134, %136 : vector<8x32xf32>
    %138 = arith.select %90, %137, %86 : vector<8x32xi1>, vector<8x32xf32>
    %cst_36 = arith.constant 0.000000e+00 : f32
    %139 = vector.broadcast %cst_36 : f32 to vector<8x32xf32>
    %140 = arith.select %90, %137, %139 : vector<8x32xi1>, vector<8x32xf32>
    %c2_i32 = arith.constant 2 : i32
    %141 = vector.broadcast %c2_i32 : i32 to vector<8x32xi32>
    %142 = arith.cmpi sgt, %30, %141 : vector<8x32xi32>
    %143 = vector.extract_strided_slice %12 {offsets = [16, 0], sizes = [8, 96], strides = [1, 1]} : vector<64x96xf32> to vector<8x96xf32>
    %144 = vector.extract_strided_slice %143 {offsets = [0, 0], sizes = [8, 64], strides = [1, 1]} : vector<8x96xf32> to vector<8x64xf32>
    %145 = vector.extract_strided_slice %113 {offsets = [0, 0], sizes = [8, 64], strides = [1, 1]} : vector<8x96xf32> to vector<8x64xf32>
    %146 = arith.addf %144, %145 : vector<8x64xf32>
    %147 = arith.negf %146 : vector<8x64xf32>
    %148 = math.exp %147 : vector<8x64xf32>
    %cst_37 = arith.constant 1.000000e+00 : f32
    %149 = vector.broadcast %cst_37 : f32 to vector<8x64xf32>
    %150 = arith.addf %149, %148 : vector<8x64xf32>
    %151 = arith.divf %149, %150 : vector<8x64xf32>
    %152 = vector.extract_strided_slice %151 {offsets = [0, 0], sizes = [8, 32], strides = [1, 1]} : vector<8x64xf32> to vector<8x32xf32>
    %153 = vector.extract_strided_slice %151 {offsets = [0, 32], sizes = [8, 32], strides = [1, 1]} : vector<8x64xf32> to vector<8x32xf32>
    %154 = vector.extract_strided_slice %143 {offsets = [0, 64], sizes = [8, 32], strides = [1, 1]} : vector<8x96xf32> to vector<8x32xf32>
    %155 = vector.extract_strided_slice %113 {offsets = [0, 64], sizes = [8, 32], strides = [1, 1]} : vector<8x96xf32> to vector<8x32xf32>
    %156 = arith.addf %155, %24 : vector<8x32xf32>
    %157 = arith.mulf %152, %156 : vector<8x32xf32>
    %158 = arith.addf %154, %157 : vector<8x32xf32>
    %159 = math.tanh %158 : vector<8x32xf32>
    %160 = arith.subf %111, %159 : vector<8x32xf32>
    %161 = arith.mulf %153, %160 : vector<8x32xf32>
    %162 = arith.addf %159, %161 : vector<8x32xf32>
    %163 = arith.select %142, %162, %111 : vector<8x32xi1>, vector<8x32xf32>
    %164 = arith.truncf %163 : vector<8x32xf32> to vector<8x32xbf16>
    %cst_38 = arith.constant dense<0.000000e+00> : vector<8x96xf32>
    %165 = tpu.matmul %164, %14, %cst_38 {dimension_numbers = #tpu.dot_dimension_numbers<[1], [0], [0], [1], [0, 0, 1, 1], [], []>} : vector<8x32xbf16>, vector<32x96xbf16>, vector<8x96xf32> -> vector<8x96xf32>
    %166 = arith.truncf %162 : vector<8x32xf32> to vector<8x32xbf16>
    %cst_39 = arith.constant dense<0.000000e+00> : vector<8x96xf32>
    %167 = tpu.matmul %166, %16, %cst_39 {dimension_numbers = #tpu.dot_dimension_numbers<[1], [0], [0], [1], [0, 0, 1, 1], [], []>} : vector<8x32xbf16>, vector<32x96xbf16>, vector<8x96xf32> -> vector<8x96xf32>
    %168 = arith.addf %167, %21 : vector<8x96xf32>
    %169 = arith.truncf %138 : vector<8x32xf32> to vector<8x32xbf16>
    %cst_40 = arith.constant dense<0.000000e+00> : vector<8x96xf32>
    %170 = tpu.matmul %169, %18, %cst_40 {dimension_numbers = #tpu.dot_dimension_numbers<[1], [0], [0], [1], [0, 0, 1, 1], [], []>} : vector<8x32xbf16>, vector<32x96xbf16>, vector<8x96xf32> -> vector<8x96xf32>
    %171 = vector.extract_strided_slice %168 {offsets = [0, 0], sizes = [8, 64], strides = [1, 1]} : vector<8x96xf32> to vector<8x64xf32>
    %172 = vector.extract_strided_slice %170 {offsets = [0, 0], sizes = [8, 64], strides = [1, 1]} : vector<8x96xf32> to vector<8x64xf32>
    %173 = arith.addf %171, %172 : vector<8x64xf32>
    %174 = arith.negf %173 : vector<8x64xf32>
    %175 = math.exp %174 : vector<8x64xf32>
    %cst_41 = arith.constant 1.000000e+00 : f32
    %176 = vector.broadcast %cst_41 : f32 to vector<8x64xf32>
    %177 = arith.addf %176, %175 : vector<8x64xf32>
    %178 = arith.divf %176, %177 : vector<8x64xf32>
    %179 = vector.extract_strided_slice %178 {offsets = [0, 0], sizes = [8, 32], strides = [1, 1]} : vector<8x64xf32> to vector<8x32xf32>
    %180 = vector.extract_strided_slice %178 {offsets = [0, 32], sizes = [8, 32], strides = [1, 1]} : vector<8x64xf32> to vector<8x32xf32>
    %181 = vector.extract_strided_slice %168 {offsets = [0, 64], sizes = [8, 32], strides = [1, 1]} : vector<8x96xf32> to vector<8x32xf32>
    %182 = vector.extract_strided_slice %170 {offsets = [0, 64], sizes = [8, 32], strides = [1, 1]} : vector<8x96xf32> to vector<8x32xf32>
    %183 = arith.addf %182, %27 : vector<8x32xf32>
    %184 = arith.mulf %179, %183 : vector<8x32xf32>
    %185 = arith.addf %181, %184 : vector<8x32xf32>
    %186 = math.tanh %185 : vector<8x32xf32>
    %187 = arith.subf %138, %186 : vector<8x32xf32>
    %188 = arith.mulf %180, %187 : vector<8x32xf32>
    %189 = arith.addf %186, %188 : vector<8x32xf32>
    %190 = arith.select %142, %189, %138 : vector<8x32xi1>, vector<8x32xf32>
    %cst_42 = arith.constant 0.000000e+00 : f32
    %191 = vector.broadcast %cst_42 : f32 to vector<8x32xf32>
    %192 = arith.select %142, %189, %191 : vector<8x32xi1>, vector<8x32xf32>
    %c3_i32 = arith.constant 3 : i32
    %193 = vector.broadcast %c3_i32 : i32 to vector<8x32xi32>
    %194 = arith.cmpi sgt, %30, %193 : vector<8x32xi32>
    %195 = vector.extract_strided_slice %12 {offsets = [24, 0], sizes = [8, 96], strides = [1, 1]} : vector<64x96xf32> to vector<8x96xf32>
    %196 = vector.extract_strided_slice %195 {offsets = [0, 0], sizes = [8, 64], strides = [1, 1]} : vector<8x96xf32> to vector<8x64xf32>
    %197 = vector.extract_strided_slice %165 {offsets = [0, 0], sizes = [8, 64], strides = [1, 1]} : vector<8x96xf32> to vector<8x64xf32>
    %198 = arith.addf %196, %197 : vector<8x64xf32>
    %199 = arith.negf %198 : vector<8x64xf32>
    %200 = math.exp %199 : vector<8x64xf32>
    %cst_43 = arith.constant 1.000000e+00 : f32
    %201 = vector.broadcast %cst_43 : f32 to vector<8x64xf32>
    %202 = arith.addf %201, %200 : vector<8x64xf32>
    %203 = arith.divf %201, %202 : vector<8x64xf32>
    %204 = vector.extract_strided_slice %203 {offsets = [0, 0], sizes = [8, 32], strides = [1, 1]} : vector<8x64xf32> to vector<8x32xf32>
    %205 = vector.extract_strided_slice %203 {offsets = [0, 32], sizes = [8, 32], strides = [1, 1]} : vector<8x64xf32> to vector<8x32xf32>
    %206 = vector.extract_strided_slice %195 {offsets = [0, 64], sizes = [8, 32], strides = [1, 1]} : vector<8x96xf32> to vector<8x32xf32>
    %207 = vector.extract_strided_slice %165 {offsets = [0, 64], sizes = [8, 32], strides = [1, 1]} : vector<8x96xf32> to vector<8x32xf32>
    %208 = arith.addf %207, %24 : vector<8x32xf32>
    %209 = arith.mulf %204, %208 : vector<8x32xf32>
    %210 = arith.addf %206, %209 : vector<8x32xf32>
    %211 = math.tanh %210 : vector<8x32xf32>
    %212 = arith.subf %163, %211 : vector<8x32xf32>
    %213 = arith.mulf %205, %212 : vector<8x32xf32>
    %214 = arith.addf %211, %213 : vector<8x32xf32>
    %215 = arith.select %194, %214, %163 : vector<8x32xi1>, vector<8x32xf32>
    %216 = arith.truncf %215 : vector<8x32xf32> to vector<8x32xbf16>
    %cst_44 = arith.constant dense<0.000000e+00> : vector<8x96xf32>
    %217 = tpu.matmul %216, %14, %cst_44 {dimension_numbers = #tpu.dot_dimension_numbers<[1], [0], [0], [1], [0, 0, 1, 1], [], []>} : vector<8x32xbf16>, vector<32x96xbf16>, vector<8x96xf32> -> vector<8x96xf32>
    %218 = arith.truncf %214 : vector<8x32xf32> to vector<8x32xbf16>
    %cst_45 = arith.constant dense<0.000000e+00> : vector<8x96xf32>
    %219 = tpu.matmul %218, %16, %cst_45 {dimension_numbers = #tpu.dot_dimension_numbers<[1], [0], [0], [1], [0, 0, 1, 1], [], []>} : vector<8x32xbf16>, vector<32x96xbf16>, vector<8x96xf32> -> vector<8x96xf32>
    %220 = arith.addf %219, %21 : vector<8x96xf32>
    %221 = arith.truncf %190 : vector<8x32xf32> to vector<8x32xbf16>
    %cst_46 = arith.constant dense<0.000000e+00> : vector<8x96xf32>
    %222 = tpu.matmul %221, %18, %cst_46 {dimension_numbers = #tpu.dot_dimension_numbers<[1], [0], [0], [1], [0, 0, 1, 1], [], []>} : vector<8x32xbf16>, vector<32x96xbf16>, vector<8x96xf32> -> vector<8x96xf32>
    %223 = vector.extract_strided_slice %220 {offsets = [0, 0], sizes = [8, 64], strides = [1, 1]} : vector<8x96xf32> to vector<8x64xf32>
    %224 = vector.extract_strided_slice %222 {offsets = [0, 0], sizes = [8, 64], strides = [1, 1]} : vector<8x96xf32> to vector<8x64xf32>
    %225 = arith.addf %223, %224 : vector<8x64xf32>
    %226 = arith.negf %225 : vector<8x64xf32>
    %227 = math.exp %226 : vector<8x64xf32>
    %cst_47 = arith.constant 1.000000e+00 : f32
    %228 = vector.broadcast %cst_47 : f32 to vector<8x64xf32>
    %229 = arith.addf %228, %227 : vector<8x64xf32>
    %230 = arith.divf %228, %229 : vector<8x64xf32>
    %231 = vector.extract_strided_slice %230 {offsets = [0, 0], sizes = [8, 32], strides = [1, 1]} : vector<8x64xf32> to vector<8x32xf32>
    %232 = vector.extract_strided_slice %230 {offsets = [0, 32], sizes = [8, 32], strides = [1, 1]} : vector<8x64xf32> to vector<8x32xf32>
    %233 = vector.extract_strided_slice %220 {offsets = [0, 64], sizes = [8, 32], strides = [1, 1]} : vector<8x96xf32> to vector<8x32xf32>
    %234 = vector.extract_strided_slice %222 {offsets = [0, 64], sizes = [8, 32], strides = [1, 1]} : vector<8x96xf32> to vector<8x32xf32>
    %235 = arith.addf %234, %27 : vector<8x32xf32>
    %236 = arith.mulf %231, %235 : vector<8x32xf32>
    %237 = arith.addf %233, %236 : vector<8x32xf32>
    %238 = math.tanh %237 : vector<8x32xf32>
    %239 = arith.subf %190, %238 : vector<8x32xf32>
    %240 = arith.mulf %232, %239 : vector<8x32xf32>
    %241 = arith.addf %238, %240 : vector<8x32xf32>
    %242 = arith.select %194, %241, %190 : vector<8x32xi1>, vector<8x32xf32>
    %cst_48 = arith.constant 0.000000e+00 : f32
    %243 = vector.broadcast %cst_48 : f32 to vector<8x32xf32>
    %244 = arith.select %194, %241, %243 : vector<8x32xi1>, vector<8x32xf32>
    %c4_i32 = arith.constant 4 : i32
    %245 = vector.broadcast %c4_i32 : i32 to vector<8x32xi32>
    %246 = arith.cmpi sgt, %30, %245 : vector<8x32xi32>
    %247 = vector.extract_strided_slice %12 {offsets = [32, 0], sizes = [8, 96], strides = [1, 1]} : vector<64x96xf32> to vector<8x96xf32>
    %248 = vector.extract_strided_slice %247 {offsets = [0, 0], sizes = [8, 64], strides = [1, 1]} : vector<8x96xf32> to vector<8x64xf32>
    %249 = vector.extract_strided_slice %217 {offsets = [0, 0], sizes = [8, 64], strides = [1, 1]} : vector<8x96xf32> to vector<8x64xf32>
    %250 = arith.addf %248, %249 : vector<8x64xf32>
    %251 = arith.negf %250 : vector<8x64xf32>
    %252 = math.exp %251 : vector<8x64xf32>
    %cst_49 = arith.constant 1.000000e+00 : f32
    %253 = vector.broadcast %cst_49 : f32 to vector<8x64xf32>
    %254 = arith.addf %253, %252 : vector<8x64xf32>
    %255 = arith.divf %253, %254 : vector<8x64xf32>
    %256 = vector.extract_strided_slice %255 {offsets = [0, 0], sizes = [8, 32], strides = [1, 1]} : vector<8x64xf32> to vector<8x32xf32>
    %257 = vector.extract_strided_slice %255 {offsets = [0, 32], sizes = [8, 32], strides = [1, 1]} : vector<8x64xf32> to vector<8x32xf32>
    %258 = vector.extract_strided_slice %247 {offsets = [0, 64], sizes = [8, 32], strides = [1, 1]} : vector<8x96xf32> to vector<8x32xf32>
    %259 = vector.extract_strided_slice %217 {offsets = [0, 64], sizes = [8, 32], strides = [1, 1]} : vector<8x96xf32> to vector<8x32xf32>
    %260 = arith.addf %259, %24 : vector<8x32xf32>
    %261 = arith.mulf %256, %260 : vector<8x32xf32>
    %262 = arith.addf %258, %261 : vector<8x32xf32>
    %263 = math.tanh %262 : vector<8x32xf32>
    %264 = arith.subf %215, %263 : vector<8x32xf32>
    %265 = arith.mulf %257, %264 : vector<8x32xf32>
    %266 = arith.addf %263, %265 : vector<8x32xf32>
    %267 = arith.select %246, %266, %215 : vector<8x32xi1>, vector<8x32xf32>
    %268 = arith.truncf %267 : vector<8x32xf32> to vector<8x32xbf16>
    %cst_50 = arith.constant dense<0.000000e+00> : vector<8x96xf32>
    %269 = tpu.matmul %268, %14, %cst_50 {dimension_numbers = #tpu.dot_dimension_numbers<[1], [0], [0], [1], [0, 0, 1, 1], [], []>} : vector<8x32xbf16>, vector<32x96xbf16>, vector<8x96xf32> -> vector<8x96xf32>
    %270 = arith.truncf %266 : vector<8x32xf32> to vector<8x32xbf16>
    %cst_51 = arith.constant dense<0.000000e+00> : vector<8x96xf32>
    %271 = tpu.matmul %270, %16, %cst_51 {dimension_numbers = #tpu.dot_dimension_numbers<[1], [0], [0], [1], [0, 0, 1, 1], [], []>} : vector<8x32xbf16>, vector<32x96xbf16>, vector<8x96xf32> -> vector<8x96xf32>
    %272 = arith.addf %271, %21 : vector<8x96xf32>
    %273 = arith.truncf %242 : vector<8x32xf32> to vector<8x32xbf16>
    %cst_52 = arith.constant dense<0.000000e+00> : vector<8x96xf32>
    %274 = tpu.matmul %273, %18, %cst_52 {dimension_numbers = #tpu.dot_dimension_numbers<[1], [0], [0], [1], [0, 0, 1, 1], [], []>} : vector<8x32xbf16>, vector<32x96xbf16>, vector<8x96xf32> -> vector<8x96xf32>
    %275 = vector.extract_strided_slice %272 {offsets = [0, 0], sizes = [8, 64], strides = [1, 1]} : vector<8x96xf32> to vector<8x64xf32>
    %276 = vector.extract_strided_slice %274 {offsets = [0, 0], sizes = [8, 64], strides = [1, 1]} : vector<8x96xf32> to vector<8x64xf32>
    %277 = arith.addf %275, %276 : vector<8x64xf32>
    %278 = arith.negf %277 : vector<8x64xf32>
    %279 = math.exp %278 : vector<8x64xf32>
    %cst_53 = arith.constant 1.000000e+00 : f32
    %280 = vector.broadcast %cst_53 : f32 to vector<8x64xf32>
    %281 = arith.addf %280, %279 : vector<8x64xf32>
    %282 = arith.divf %280, %281 : vector<8x64xf32>
    %283 = vector.extract_strided_slice %282 {offsets = [0, 0], sizes = [8, 32], strides = [1, 1]} : vector<8x64xf32> to vector<8x32xf32>
    %284 = vector.extract_strided_slice %282 {offsets = [0, 32], sizes = [8, 32], strides = [1, 1]} : vector<8x64xf32> to vector<8x32xf32>
    %285 = vector.extract_strided_slice %272 {offsets = [0, 64], sizes = [8, 32], strides = [1, 1]} : vector<8x96xf32> to vector<8x32xf32>
    %286 = vector.extract_strided_slice %274 {offsets = [0, 64], sizes = [8, 32], strides = [1, 1]} : vector<8x96xf32> to vector<8x32xf32>
    %287 = arith.addf %286, %27 : vector<8x32xf32>
    %288 = arith.mulf %283, %287 : vector<8x32xf32>
    %289 = arith.addf %285, %288 : vector<8x32xf32>
    %290 = math.tanh %289 : vector<8x32xf32>
    %291 = arith.subf %242, %290 : vector<8x32xf32>
    %292 = arith.mulf %284, %291 : vector<8x32xf32>
    %293 = arith.addf %290, %292 : vector<8x32xf32>
    %294 = arith.select %246, %293, %242 : vector<8x32xi1>, vector<8x32xf32>
    %cst_54 = arith.constant 0.000000e+00 : f32
    %295 = vector.broadcast %cst_54 : f32 to vector<8x32xf32>
    %296 = arith.select %246, %293, %295 : vector<8x32xi1>, vector<8x32xf32>
    %c5_i32 = arith.constant 5 : i32
    %297 = vector.broadcast %c5_i32 : i32 to vector<8x32xi32>
    %298 = arith.cmpi sgt, %30, %297 : vector<8x32xi32>
    %299 = vector.extract_strided_slice %12 {offsets = [40, 0], sizes = [8, 96], strides = [1, 1]} : vector<64x96xf32> to vector<8x96xf32>
    %300 = vector.extract_strided_slice %299 {offsets = [0, 0], sizes = [8, 64], strides = [1, 1]} : vector<8x96xf32> to vector<8x64xf32>
    %301 = vector.extract_strided_slice %269 {offsets = [0, 0], sizes = [8, 64], strides = [1, 1]} : vector<8x96xf32> to vector<8x64xf32>
    %302 = arith.addf %300, %301 : vector<8x64xf32>
    %303 = arith.negf %302 : vector<8x64xf32>
    %304 = math.exp %303 : vector<8x64xf32>
    %cst_55 = arith.constant 1.000000e+00 : f32
    %305 = vector.broadcast %cst_55 : f32 to vector<8x64xf32>
    %306 = arith.addf %305, %304 : vector<8x64xf32>
    %307 = arith.divf %305, %306 : vector<8x64xf32>
    %308 = vector.extract_strided_slice %307 {offsets = [0, 0], sizes = [8, 32], strides = [1, 1]} : vector<8x64xf32> to vector<8x32xf32>
    %309 = vector.extract_strided_slice %307 {offsets = [0, 32], sizes = [8, 32], strides = [1, 1]} : vector<8x64xf32> to vector<8x32xf32>
    %310 = vector.extract_strided_slice %299 {offsets = [0, 64], sizes = [8, 32], strides = [1, 1]} : vector<8x96xf32> to vector<8x32xf32>
    %311 = vector.extract_strided_slice %269 {offsets = [0, 64], sizes = [8, 32], strides = [1, 1]} : vector<8x96xf32> to vector<8x32xf32>
    %312 = arith.addf %311, %24 : vector<8x32xf32>
    %313 = arith.mulf %308, %312 : vector<8x32xf32>
    %314 = arith.addf %310, %313 : vector<8x32xf32>
    %315 = math.tanh %314 : vector<8x32xf32>
    %316 = arith.subf %267, %315 : vector<8x32xf32>
    %317 = arith.mulf %309, %316 : vector<8x32xf32>
    %318 = arith.addf %315, %317 : vector<8x32xf32>
    %319 = arith.select %298, %318, %267 : vector<8x32xi1>, vector<8x32xf32>
    %320 = arith.truncf %319 : vector<8x32xf32> to vector<8x32xbf16>
    %cst_56 = arith.constant dense<0.000000e+00> : vector<8x96xf32>
    %321 = tpu.matmul %320, %14, %cst_56 {dimension_numbers = #tpu.dot_dimension_numbers<[1], [0], [0], [1], [0, 0, 1, 1], [], []>} : vector<8x32xbf16>, vector<32x96xbf16>, vector<8x96xf32> -> vector<8x96xf32>
    %322 = arith.truncf %318 : vector<8x32xf32> to vector<8x32xbf16>
    %cst_57 = arith.constant dense<0.000000e+00> : vector<8x96xf32>
    %323 = tpu.matmul %322, %16, %cst_57 {dimension_numbers = #tpu.dot_dimension_numbers<[1], [0], [0], [1], [0, 0, 1, 1], [], []>} : vector<8x32xbf16>, vector<32x96xbf16>, vector<8x96xf32> -> vector<8x96xf32>
    %324 = arith.addf %323, %21 : vector<8x96xf32>
    %325 = arith.truncf %294 : vector<8x32xf32> to vector<8x32xbf16>
    %cst_58 = arith.constant dense<0.000000e+00> : vector<8x96xf32>
    %326 = tpu.matmul %325, %18, %cst_58 {dimension_numbers = #tpu.dot_dimension_numbers<[1], [0], [0], [1], [0, 0, 1, 1], [], []>} : vector<8x32xbf16>, vector<32x96xbf16>, vector<8x96xf32> -> vector<8x96xf32>
    %327 = vector.extract_strided_slice %324 {offsets = [0, 0], sizes = [8, 64], strides = [1, 1]} : vector<8x96xf32> to vector<8x64xf32>
    %328 = vector.extract_strided_slice %326 {offsets = [0, 0], sizes = [8, 64], strides = [1, 1]} : vector<8x96xf32> to vector<8x64xf32>
    %329 = arith.addf %327, %328 : vector<8x64xf32>
    %330 = arith.negf %329 : vector<8x64xf32>
    %331 = math.exp %330 : vector<8x64xf32>
    %cst_59 = arith.constant 1.000000e+00 : f32
    %332 = vector.broadcast %cst_59 : f32 to vector<8x64xf32>
    %333 = arith.addf %332, %331 : vector<8x64xf32>
    %334 = arith.divf %332, %333 : vector<8x64xf32>
    %335 = vector.extract_strided_slice %334 {offsets = [0, 0], sizes = [8, 32], strides = [1, 1]} : vector<8x64xf32> to vector<8x32xf32>
    %336 = vector.extract_strided_slice %334 {offsets = [0, 32], sizes = [8, 32], strides = [1, 1]} : vector<8x64xf32> to vector<8x32xf32>
    %337 = vector.extract_strided_slice %324 {offsets = [0, 64], sizes = [8, 32], strides = [1, 1]} : vector<8x96xf32> to vector<8x32xf32>
    %338 = vector.extract_strided_slice %326 {offsets = [0, 64], sizes = [8, 32], strides = [1, 1]} : vector<8x96xf32> to vector<8x32xf32>
    %339 = arith.addf %338, %27 : vector<8x32xf32>
    %340 = arith.mulf %335, %339 : vector<8x32xf32>
    %341 = arith.addf %337, %340 : vector<8x32xf32>
    %342 = math.tanh %341 : vector<8x32xf32>
    %343 = arith.subf %294, %342 : vector<8x32xf32>
    %344 = arith.mulf %336, %343 : vector<8x32xf32>
    %345 = arith.addf %342, %344 : vector<8x32xf32>
    %346 = arith.select %298, %345, %294 : vector<8x32xi1>, vector<8x32xf32>
    %cst_60 = arith.constant 0.000000e+00 : f32
    %347 = vector.broadcast %cst_60 : f32 to vector<8x32xf32>
    %348 = arith.select %298, %345, %347 : vector<8x32xi1>, vector<8x32xf32>
    %c6_i32 = arith.constant 6 : i32
    %349 = vector.broadcast %c6_i32 : i32 to vector<8x32xi32>
    %350 = arith.cmpi sgt, %30, %349 : vector<8x32xi32>
    %351 = vector.extract_strided_slice %12 {offsets = [48, 0], sizes = [8, 96], strides = [1, 1]} : vector<64x96xf32> to vector<8x96xf32>
    %352 = vector.extract_strided_slice %351 {offsets = [0, 0], sizes = [8, 64], strides = [1, 1]} : vector<8x96xf32> to vector<8x64xf32>
    %353 = vector.extract_strided_slice %321 {offsets = [0, 0], sizes = [8, 64], strides = [1, 1]} : vector<8x96xf32> to vector<8x64xf32>
    %354 = arith.addf %352, %353 : vector<8x64xf32>
    %355 = arith.negf %354 : vector<8x64xf32>
    %356 = math.exp %355 : vector<8x64xf32>
    %cst_61 = arith.constant 1.000000e+00 : f32
    %357 = vector.broadcast %cst_61 : f32 to vector<8x64xf32>
    %358 = arith.addf %357, %356 : vector<8x64xf32>
    %359 = arith.divf %357, %358 : vector<8x64xf32>
    %360 = vector.extract_strided_slice %359 {offsets = [0, 0], sizes = [8, 32], strides = [1, 1]} : vector<8x64xf32> to vector<8x32xf32>
    %361 = vector.extract_strided_slice %359 {offsets = [0, 32], sizes = [8, 32], strides = [1, 1]} : vector<8x64xf32> to vector<8x32xf32>
    %362 = vector.extract_strided_slice %351 {offsets = [0, 64], sizes = [8, 32], strides = [1, 1]} : vector<8x96xf32> to vector<8x32xf32>
    %363 = vector.extract_strided_slice %321 {offsets = [0, 64], sizes = [8, 32], strides = [1, 1]} : vector<8x96xf32> to vector<8x32xf32>
    %364 = arith.addf %363, %24 : vector<8x32xf32>
    %365 = arith.mulf %360, %364 : vector<8x32xf32>
    %366 = arith.addf %362, %365 : vector<8x32xf32>
    %367 = math.tanh %366 : vector<8x32xf32>
    %368 = arith.subf %319, %367 : vector<8x32xf32>
    %369 = arith.mulf %361, %368 : vector<8x32xf32>
    %370 = arith.addf %367, %369 : vector<8x32xf32>
    %371 = arith.select %350, %370, %319 : vector<8x32xi1>, vector<8x32xf32>
    %372 = arith.truncf %371 : vector<8x32xf32> to vector<8x32xbf16>
    %cst_62 = arith.constant dense<0.000000e+00> : vector<8x96xf32>
    %373 = tpu.matmul %372, %14, %cst_62 {dimension_numbers = #tpu.dot_dimension_numbers<[1], [0], [0], [1], [0, 0, 1, 1], [], []>} : vector<8x32xbf16>, vector<32x96xbf16>, vector<8x96xf32> -> vector<8x96xf32>
    %374 = arith.truncf %370 : vector<8x32xf32> to vector<8x32xbf16>
    %cst_63 = arith.constant dense<0.000000e+00> : vector<8x96xf32>
    %375 = tpu.matmul %374, %16, %cst_63 {dimension_numbers = #tpu.dot_dimension_numbers<[1], [0], [0], [1], [0, 0, 1, 1], [], []>} : vector<8x32xbf16>, vector<32x96xbf16>, vector<8x96xf32> -> vector<8x96xf32>
    %376 = arith.addf %375, %21 : vector<8x96xf32>
    %377 = arith.truncf %346 : vector<8x32xf32> to vector<8x32xbf16>
    %cst_64 = arith.constant dense<0.000000e+00> : vector<8x96xf32>
    %378 = tpu.matmul %377, %18, %cst_64 {dimension_numbers = #tpu.dot_dimension_numbers<[1], [0], [0], [1], [0, 0, 1, 1], [], []>} : vector<8x32xbf16>, vector<32x96xbf16>, vector<8x96xf32> -> vector<8x96xf32>
    %379 = vector.extract_strided_slice %376 {offsets = [0, 0], sizes = [8, 64], strides = [1, 1]} : vector<8x96xf32> to vector<8x64xf32>
    %380 = vector.extract_strided_slice %378 {offsets = [0, 0], sizes = [8, 64], strides = [1, 1]} : vector<8x96xf32> to vector<8x64xf32>
    %381 = arith.addf %379, %380 : vector<8x64xf32>
    %382 = arith.negf %381 : vector<8x64xf32>
    %383 = math.exp %382 : vector<8x64xf32>
    %cst_65 = arith.constant 1.000000e+00 : f32
    %384 = vector.broadcast %cst_65 : f32 to vector<8x64xf32>
    %385 = arith.addf %384, %383 : vector<8x64xf32>
    %386 = arith.divf %384, %385 : vector<8x64xf32>
    %387 = vector.extract_strided_slice %386 {offsets = [0, 0], sizes = [8, 32], strides = [1, 1]} : vector<8x64xf32> to vector<8x32xf32>
    %388 = vector.extract_strided_slice %386 {offsets = [0, 32], sizes = [8, 32], strides = [1, 1]} : vector<8x64xf32> to vector<8x32xf32>
    %389 = vector.extract_strided_slice %376 {offsets = [0, 64], sizes = [8, 32], strides = [1, 1]} : vector<8x96xf32> to vector<8x32xf32>
    %390 = vector.extract_strided_slice %378 {offsets = [0, 64], sizes = [8, 32], strides = [1, 1]} : vector<8x96xf32> to vector<8x32xf32>
    %391 = arith.addf %390, %27 : vector<8x32xf32>
    %392 = arith.mulf %387, %391 : vector<8x32xf32>
    %393 = arith.addf %389, %392 : vector<8x32xf32>
    %394 = math.tanh %393 : vector<8x32xf32>
    %395 = arith.subf %346, %394 : vector<8x32xf32>
    %396 = arith.mulf %388, %395 : vector<8x32xf32>
    %397 = arith.addf %394, %396 : vector<8x32xf32>
    %398 = arith.select %350, %397, %346 : vector<8x32xi1>, vector<8x32xf32>
    %cst_66 = arith.constant 0.000000e+00 : f32
    %399 = vector.broadcast %cst_66 : f32 to vector<8x32xf32>
    %400 = arith.select %350, %397, %399 : vector<8x32xi1>, vector<8x32xf32>
    %c7_i32 = arith.constant 7 : i32
    %401 = vector.broadcast %c7_i32 : i32 to vector<8x32xi32>
    %402 = arith.cmpi sgt, %30, %401 : vector<8x32xi32>
    %403 = vector.extract_strided_slice %12 {offsets = [56, 0], sizes = [8, 96], strides = [1, 1]} : vector<64x96xf32> to vector<8x96xf32>
    %404 = vector.extract_strided_slice %403 {offsets = [0, 0], sizes = [8, 64], strides = [1, 1]} : vector<8x96xf32> to vector<8x64xf32>
    %405 = vector.extract_strided_slice %373 {offsets = [0, 0], sizes = [8, 64], strides = [1, 1]} : vector<8x96xf32> to vector<8x64xf32>
    %406 = arith.addf %404, %405 : vector<8x64xf32>
    %407 = arith.negf %406 : vector<8x64xf32>
    %408 = math.exp %407 : vector<8x64xf32>
    %cst_67 = arith.constant 1.000000e+00 : f32
    %409 = vector.broadcast %cst_67 : f32 to vector<8x64xf32>
    %410 = arith.addf %409, %408 : vector<8x64xf32>
    %411 = arith.divf %409, %410 : vector<8x64xf32>
    %412 = vector.extract_strided_slice %411 {offsets = [0, 0], sizes = [8, 32], strides = [1, 1]} : vector<8x64xf32> to vector<8x32xf32>
    %413 = vector.extract_strided_slice %411 {offsets = [0, 32], sizes = [8, 32], strides = [1, 1]} : vector<8x64xf32> to vector<8x32xf32>
    %414 = vector.extract_strided_slice %403 {offsets = [0, 64], sizes = [8, 32], strides = [1, 1]} : vector<8x96xf32> to vector<8x32xf32>
    %415 = vector.extract_strided_slice %373 {offsets = [0, 64], sizes = [8, 32], strides = [1, 1]} : vector<8x96xf32> to vector<8x32xf32>
    %416 = arith.addf %415, %24 : vector<8x32xf32>
    %417 = arith.mulf %412, %416 : vector<8x32xf32>
    %418 = arith.addf %414, %417 : vector<8x32xf32>
    %419 = math.tanh %418 : vector<8x32xf32>
    %420 = arith.subf %371, %419 : vector<8x32xf32>
    %421 = arith.mulf %413, %420 : vector<8x32xf32>
    %422 = arith.addf %419, %421 : vector<8x32xf32>
    %423 = arith.select %402, %422, %371 : vector<8x32xi1>, vector<8x32xf32>
    %424 = arith.truncf %422 : vector<8x32xf32> to vector<8x32xbf16>
    %cst_68 = arith.constant dense<0.000000e+00> : vector<8x96xf32>
    %425 = tpu.matmul %424, %16, %cst_68 {dimension_numbers = #tpu.dot_dimension_numbers<[1], [0], [0], [1], [0, 0, 1, 1], [], []>} : vector<8x32xbf16>, vector<32x96xbf16>, vector<8x96xf32> -> vector<8x96xf32>
    %426 = arith.addf %425, %21 : vector<8x96xf32>
    %427 = arith.truncf %398 : vector<8x32xf32> to vector<8x32xbf16>
    %cst_69 = arith.constant dense<0.000000e+00> : vector<8x96xf32>
    %428 = tpu.matmul %427, %18, %cst_69 {dimension_numbers = #tpu.dot_dimension_numbers<[1], [0], [0], [1], [0, 0, 1, 1], [], []>} : vector<8x32xbf16>, vector<32x96xbf16>, vector<8x96xf32> -> vector<8x96xf32>
    %429 = vector.extract_strided_slice %426 {offsets = [0, 0], sizes = [8, 64], strides = [1, 1]} : vector<8x96xf32> to vector<8x64xf32>
    %430 = vector.extract_strided_slice %428 {offsets = [0, 0], sizes = [8, 64], strides = [1, 1]} : vector<8x96xf32> to vector<8x64xf32>
    %431 = arith.addf %429, %430 : vector<8x64xf32>
    %432 = arith.negf %431 : vector<8x64xf32>
    %433 = math.exp %432 : vector<8x64xf32>
    %cst_70 = arith.constant 1.000000e+00 : f32
    %434 = vector.broadcast %cst_70 : f32 to vector<8x64xf32>
    %435 = arith.addf %434, %433 : vector<8x64xf32>
    %436 = arith.divf %434, %435 : vector<8x64xf32>
    %437 = vector.extract_strided_slice %436 {offsets = [0, 0], sizes = [8, 32], strides = [1, 1]} : vector<8x64xf32> to vector<8x32xf32>
    %438 = vector.extract_strided_slice %436 {offsets = [0, 32], sizes = [8, 32], strides = [1, 1]} : vector<8x64xf32> to vector<8x32xf32>
    %439 = vector.extract_strided_slice %426 {offsets = [0, 64], sizes = [8, 32], strides = [1, 1]} : vector<8x96xf32> to vector<8x32xf32>
    %440 = vector.extract_strided_slice %428 {offsets = [0, 64], sizes = [8, 32], strides = [1, 1]} : vector<8x96xf32> to vector<8x32xf32>
    %441 = arith.addf %440, %27 : vector<8x32xf32>
    %442 = arith.mulf %437, %441 : vector<8x32xf32>
    %443 = arith.addf %439, %442 : vector<8x32xf32>
    %444 = math.tanh %443 : vector<8x32xf32>
    %445 = arith.subf %398, %444 : vector<8x32xf32>
    %446 = arith.mulf %438, %445 : vector<8x32xf32>
    %447 = arith.addf %444, %446 : vector<8x32xf32>
    %448 = arith.select %402, %447, %398 : vector<8x32xi1>, vector<8x32xf32>
    %cst_71 = arith.constant 0.000000e+00 : f32
    %449 = vector.broadcast %cst_71 : f32 to vector<8x32xf32>
    %450 = arith.select %402, %447, %449 : vector<8x32xi1>, vector<8x32xf32>
    %451 = tpu.concatenate %88, %140, %192, %244, %296, %348, %400, %450 in 1 : vector<8x32xf32>, vector<8x32xf32>, vector<8x32xf32>, vector<8x32xf32>, vector<8x32xf32>, vector<8x32xf32>, vector<8x32xf32>, vector<8x32xf32> -> vector<8x256xf32>
    %c0_72 = arith.constant 0 : index
    %c0_73 = arith.constant 0 : index
    %452 = vector.load %arg11[%c0_72, %c0_73] : memref<8x256xf32, #tpu.memory_space<vmem>>, vector<8x256xf32>
    tpu.vector_store %arg11[%c0_72, %c0_73], %451 {strides = array<i32>} : memref<8x256xf32, #tpu.memory_space<vmem>>, vector<8x256xf32>,
    %453 = vector.shape_cast %423 : vector<8x32xf32> to vector<1x8x32xf32>
    %454 = vector.shape_cast %448 : vector<8x32xf32> to vector<1x8x32xf32>
    %455 = tpu.concatenate %453, %454 in 0 : vector<1x8x32xf32>, vector<1x8x32xf32> -> vector<2x8x32xf32>
    %c0_74 = arith.constant 0 : index
    %c0_75 = arith.constant 0 : index
    %c0_76 = arith.constant 0 : index
    %456 = vector.load %arg12[%c0_74, %c0_75, %c0_76] : memref<2x8x32xf32, #tpu.memory_space<vmem>>, vector<2x8x32xf32>
    tpu.vector_store %arg12[%c0_74, %c0_75, %c0_76], %455 {strides = array<i32>} : memref<2x8x32xf32, #tpu.memory_space<vmem>>, vector<2x8x32xf32>,
    return
  }
}

</mosaic_0001>

<bundles_post_ra>
// kernel: encoder_rnn_forward.1
= control target key start
LH: loop header
LB: loop body
LE: loop exit
PB: predicated region body
PF: predicated region fallthrough
CT: control target
= control target key end

     0   :  { %18 = vsyncpa [#allocation3], 0  ;;  %s2470_s0 = inlined_call_operand.vmem [shape: s32[64,1], index: 0, kind: input, shape index: {}]   ;;  %s2471_s1 = inlined_call_operand.vmem [shape: s32[8,1], index: 1, kind: input, shape index: {}]   ;;  %s2472_s2 = inlined_call_operand.vmem [shape: f32[2,8,32], index: 2, kind: input, shape index: {}]   ;;  %s2473_s3 = inlined_call_operand.vmem [shape: f32[50,96], index: 3, kind: input, shape index: {}]   ;;  %s2474_s4 = inlined_call_operand.hbm [shape: f32[32,96], index: 4, kind: input, shape index: {}]   ;;  %s2475_s5 = inlined_call_operand.vmem [shape: f32[1,96], index: 5, kind: input, shape index: {}]   ;;  %s2476_s6 = inlined_call_operand.vmem [shape: f32[1,32], index: 6, kind: input, shape index: {}]   ;;  %s2477_s7 = inlined_call_operand.hbm [shape: f32[32,96], index: 7, kind: input, shape index: {}]   ;;  %s2478_s8 = inlined_call_operand.hbm [shape: f32[32,96], index: 8, kind: input, shape index: {}]   ;;  %s2479_s9 = inlined_call_operand.vmem [shape: f32[1,96], index: 9, kind: input, shape index: {}]   ;;  %s2480_s10 = inlined_call_operand.hbm [shape: f32[1,32], index: 10, kind: input, shape index: {}]   ;;  %s2481_s11 = inlined_call_operand.vmem [shape: f32[8,256], index: 11, kind: output, shape index: {0}]   ;;  %s2482_s12 = inlined_call_operand.hbm [shape: f32[2,8,32], index: 12, kind: output, shape index: {1}]  }
   0x1   :  { %19 = vsyncpa [#allocation6], 0 }
   0x2   :  { %20 = vsyncpa [#allocation9], 0 }
   0x3   :  { %21 = vsyncpa [#allocation4], 0  ;;  %s51_s23 = sshll.u32 %s2477_s7, 4  ;;  %s1845_s24 = smov [#allocation5]   ;;  %s52_s23 = int_to_ptr.hbm [resolvable:$true] %s51_s23 }
   0x4   :  { %s53_s25 = sshll.u32 %s1845_s24, 4  ;;  %s34_s28 = sshll.u32 %s2474_s4, 4  ;;  %s54_s25 = int_to_ptr.vmem [resolvable:$true] %s53_s25  ;;  %s35_s28 = int_to_ptr.hbm [resolvable:$true] %s34_s28 }
   0x5   :  { %s1846_s29 = smov 128   ;;  %s1847_s30 = smov 8  }
   0x6   :  { %59 = dma.hbm_to_vmem [thread:$0]  %s52_s23, 512, %s54_s25, [#allocation6], %s1846_s29, %s1846_s29, %s1847_s30  }
   0x7   :  { %s1848_s13 = smov [#allocation2]   ;;  %s64_s7 = sshll.u32 %s2478_s8, 4  ;;  %s65_s7 = int_to_ptr.hbm [resolvable:$true] %s64_s7 }
   0x8   :  { %s36_s14 = sshll.u32 %s1848_s13, 4  ;;  %s80_s18 = sshll.u32 %s2480_s10, 4  ;;  %s37_s14 = int_to_ptr.vmem [resolvable:$true] %s36_s14  ;;  %s81_s18 = int_to_ptr.hbm [resolvable:$true] %s80_s18 }
   0x9   :  { %42 = dma.hbm_to_vmem [thread:$0]  %s35_s28, 512, %s37_s14, [#allocation3], %s1846_s29, %s1846_s29, %s1847_s30  }
   0xa   :  { %s1849_s19 = smov [#allocation7]   ;;  %s1850_s21 = smov [#allocation8]  }
   0xb   :  { %s66_s20 = sshll.u32 %s1849_s19, 4  ;;  %s82_s8 = sshll.u32 %s1850_s21, 4  ;;  %s67_s20 = int_to_ptr.vmem [resolvable:$true] %s66_s20  ;;  %s83_s8 = int_to_ptr.vmem [resolvable:$true] %s82_s8 }
   0xc   :  { %72 = dma.hbm_to_vmem [thread:$0]  %s65_s7, 512, %s67_s20, [#allocation6], %s1846_s29, %s1846_s29, %s1847_s30  }
   0xd   :  { %85 = dma.hbm_to_vmem [thread:$0]  %s81_s18, 16, %s83_s8, [#allocation9]  }
   0xe   :  { %1837 = dma.done.wait [#allocation3], 512  }
   0xf   :  { %1838 = vsyncadd [#allocation3], 4294966784 }
  0x10   :  { %1839 = dma.done.wait [#allocation6], 1024  }
  0x11   :  { %1840 = vsyncadd [#allocation6], 4294966272 }
  0x12   :  { %1841 = dma.done.wait [#allocation9], 16  }
  0x13   :  { %1842 = vsyncadd [#allocation9], 4294967280  ;;  %v1851_v0 = vmov 0   ;;  %v103_v1 = vld [vmem:[%s2470_s0] sm:$0xff]  ;;  %v228_v2 = vld [vmem:[#allocation2 + $0x10] sm:$0xff]  ;;  %vm193_vm0 = vcmask 1040384   ;;  %v111_v24 = vlaneseq }
  0x14   :  { %1612 = vset.pattern.permute.xlu0 %v1851_v0  ;;  %1613 = vset.pattern.permute.xlu2 %v1851_v0  ;;  %v229_v3 = vld [vmem:[#allocation2 + $0x18] sm:$0xff]  ;;  %v226_v4 = vld [vmem:[#allocation2] sm:$0xff]  ;;  %v227_v5 = vld [vmem:[#allocation2 + $0x8] sm:$0xff]  ;;  %s1852_s13 = smov 64   ;;  %vm262_vm1 = vcmask 261120   ;;  %v1853_v28 = vmov 0.0  }
  0x15   :  { %1614 = vset.pattern.permute.xlu1 %v1851_v0  ;;  %114 = vperm.xlu0 %1612, %v103_v1   ;;  %v1946_v6 = vpack.c.bf16 %v229_v3, %v228_v2  ;;  %v1615_v7 = vld [vmem:[%s2476_s6] ss:$0 sm:$0xff]  ;;  %v171_v8 = vld [vmem:[%s2473_s3 + $0x30] sm:$0x3]  ;;  %v1955_v9 = vpack.c.bf16 %v227_v5, %v226_v4  ;;  %v104_v12 = vld [vmem:[%s2470_s0 + $0x8] sm:$0xff]  ;;  %v1992_v26 = vand.u32 127, %v111_v24 }
  0x16   :  { %v1960_v10 = vld [vmem:[%s2472_s2] sm:$0xff]  ;;  %300 = vrot.lane.b32.xlu1 %v1615_v7, %s1852_s13  ;;  %v175_v11 = vpack.c.bf16 %v171_v8, %v171_v8  ;;  %v170_v16 = vld [vmem:[%s2473_s3 + $0x28] sm:$0xff]  ;;  %v167_v18 = vld [vmem:[%s2473_s3 + $0x10] sm:$0xff]  ;;  %vm180_vm4 = vcmask 408576   ;;  %s1854_s24 = smov 32   ;;  %s1855_s6 = smov 96  }
  0x17   :  { %272 = vmatpush.bf16.msra.mxu1 %v1946_v6  ;;  %348 = vmatpush.bf16.msra.mxu2 %v1946_v6  ;;  %v261_v14 = vpack.c.bf16 %v1960_v10, %v1960_v10  ;;  %v169_v15 = vld [vmem:[%s2473_s3 + $0x20] sm:$0xff]  ;;  %v168_v19 = vld [vmem:[%s2473_s3 + $0x18] sm:$0xff]  ;;  %v166_v22 = vld [vmem:[%s2473_s3 + $0x8] sm:$0xff]  ;;  %s1856_s25 = smov [#allocation10]  }
  0x18   :  { %v195_v13 = vsel %vm193_vm0, %v175_v11, 0  ;;  %v174_v17 = vpack.c.bf16 %v170_v16, %v169_v15  ;;  %v173_v20 = vpack.c.bf16 %v168_v19, %v167_v18  ;;  %v165_v21 = vld [vmem:[%s2473_s3] sm:$0xff]  ;;  %v240_v63 = vld [vmem:[#allocation7 + $0x10] sm:$0xff]  ;;  %v241_v0 = vld [vmem:[#allocation7 + $0x18] sm:$0xff]  ;;  %s1528_s26 = sshll.u32 %s1856_s25, 4  ;;  %s1529_s26 = int_to_ptr.vmem [resolvable:$true] %s1528_s26 }
  0x19   :  { %201 = vmatpush.bf16.msra.mxu0 %v195_v13  ;;  %v172_v23 = vpack.c.bf16 %v166_v22, %v165_v21  ;;  %v2006_v36 = vld [vmem:[%s2475_s5] ss:$0 sm:$0xff]  ;;  %v2019_v2 = vpack.c.bf16 %v241_v0, %v240_v63  ;;  %v239_v3 = vld [vmem:[#allocation7 + $0x8] sm:$0xff]  ;;  %v235_v18 = vld [vmem:[#allocation5 + $0x18] sm:$0xff] }
  0x1a   :  { %v254_v60 = vld [vmem:[%s2471_s1] sm:$0xff]  ;;  %v2027_v7 = vld [vmem:[%s2472_s2 + $0x8] sm:$0xff]  ;;  %s1530_s1 = sshll.u32 %s2482_s12, 4  ;;  %s1531_s1 = int_to_ptr.hbm [resolvable:$true] %s1530_s1 }
  0x1b   :  { %273 = vmatpush.bf16.msra.mxu1 %v1955_v9  ;;  %349 = vmatpush.bf16.msra.mxu2 %v1955_v9  ;;  %v238_v1 = vld [vmem:[#allocation7] sm:$0xff]  ;;  %v375_v8 = vpack.c.bf16 %v2027_v7, %v2027_v7  ;;  %v233_v21 = vld [vmem:[#allocation5 + $0x8] sm:$0xff] }
  0x1c   :  { %v1617_v4 = vld [vmem:[#allocation8] ss:$0 sm:$0xff]  ;;  %v2022_v5 = vpack.c.bf16 %v239_v3, %v238_v1 }
  0x1d   :  { %117 = vperm.xlu0 %1612, %v104_v12   ;;  %202 = vmatpush.bf16.msra.mxu0 %v174_v17  ;;  %v234_v17 = vld [vmem:[#allocation5 + $0x10] sm:$0xff]  ;;  %v232_v19 = vld [vmem:[#allocation5] sm:$0xff] }
  0x1e   :  { %1560 = vmatmul.msk.bf16.vlgmr.msra.gmra.mxu1 %vm262_vm1, %v261_v14  ;;  %v2056_v22 = vpack.c.bf16 %v233_v21, %v232_v19 }
  0x1f   :  { %506 = vmatpush.bf16.msrb.mxu2 %v1946_v6  ;;  %385 = vmatpush.bf16.msrb.mxu1 %v2019_v2 }
  0x21   :  { %203 = vmatpush.bf16.msra.mxu0 %v173_v20  ;;  %v2053_v20 = vpack.c.bf16 %v235_v18, %v234_v17 }
  0x23   :  { %507 = vmatpush.bf16.msrb.mxu2 %v1955_v9  ;;  %386 = vmatpush.bf16.msrb.mxu1 %v2022_v5 }
  0x24   :  { %368 = vmatpush.bf16.msra.mxu3 %v2053_v20 }
  0x25   :  { %204 = vmatpush.bf16.msra.mxu0 %v172_v23 }
  0x27   :  { %546 = vmatpush.bf16.msra.mxu1 %v2019_v2 }
  0x28   :  { %369 = vmatpush.bf16.msra.mxu3 %v2056_v22 }
  0x29   :  { %996 = vmatpush.bf16.msrb.mxu0 %v2019_v2 }
  0x2b   :  { %547 = vmatpush.bf16.msra.mxu1 %v2022_v5 }
  0x2c   :  { %526 = vmatpush.bf16.msrb.mxu3 %v2053_v20 }
  0x2d   :  { %997 = vmatpush.bf16.msrb.mxu0 %v2022_v5 }
  0x2e   :  { %1564 = vmatmul.msk.bf16.vlgmr.msrb.gmra.mxu1 %vm262_vm1, %v375_v8 }
  0x2f   :  { %696 = vmatpush.bf16.msrb.mxu1 %v2019_v2 }
  0x30   :  { %527 = vmatpush.bf16.msrb.mxu3 %v2056_v22 }
  0x33   :  { %697 = vmatpush.bf16.msrb.mxu1 %v2022_v5 }
  0x87   :  { %v115_v25 = vpop.permute.xlu0 %114 }
  0x88   :  { %vm137_vm2 = vcmp.eq.s32.totalorder %v115_v25, %v1992_v26  ;;  %v1999_v32 = vpop.permute.xlu1 %300 }
  0x89   :  { %v1547_v29 = vsel %vm137_vm2, 1.0, %v1853_v28 }
  0x8f   :  { %v118_v27 = vpop.permute.xlu0 %117 }
  0x90   :  { %vm138_vm3 = vcmp.eq.s32.totalorder %v118_v27, %v1992_v26 }
  0x91   :  { %v1548_v30 = vsel %vm138_vm3, 1.0, %v1853_v28 }
  0x92   :  { %v161_v31 = vpack.c.bf16 %v1548_v30, %v1547_v29 }
  0x94   :  { %1555 = vmatmul.msk.bf16.vlgmr.msra.gmra.mxu0 %vm180_vm4, %v161_v31 }
  0x95   :  { %1256 = vmatpush.bf16.msra.mxu0 %v1946_v6 }
  0x99   :  { %1257 = vmatpush.bf16.msra.mxu0 %v1955_v9 }
  0x9b   :  { %v275_v33 = vpop.f32.mrf.mxu1 }
  0x9c   :  { %v303_v34 = vadd.f32 %v1999_v32, %v275_v33 }
  0x9e   :  { %305 = vrot.lane.b32.xlu1 %v303_v34, %s1852_s13 }
  0xa3   :  { %v277_v35 = vpop.f32.mrf.mxu1 }
  0xa4   :  { %v2076_v35 = vld [vmem:[%s2479_s9] ss:$0 sm:$0xff] }
  0xab   :  { %v388_v25 = vpop.f32.mrf.mxu1 }
  0xb3   :  { %v390_v29 = vpop.f32.mrf.mxu1 }
 0x110   :  { %v306_v50 = vpop.permute.xlu1 %305 }
 0x111   :  { %v206_v37 = vpop.f32.mrf.mxu0 }
 0x112   :  { %v207_v38 = vadd.f32 %v2006_v36, %v206_v37 }
 0x114   :  { %v280_v39 = vadd.f32 %v275_v33, %v207_v38 }
 0x116   :  { %v1561_v40 = vmul.f32 -1.442695, %v280_v39 }
 0x118   :  { %1619 = vpow2.f32 %v1561_v40 }
 0x11e   :  { %v1620_v41 = vpop.eup %1619 }
 0x11f   :  { %v284_v42 = vadd.f32 1.0, %v1620_v41 }
 0x121   :  { %1621 = vrcp.f32 %v284_v42  ;;  %v296_v46 = vand.u32 2147483648, %v284_v42  ;;  %v294_v48 = vand.u32 2147483647, %v284_v42  ;;  %vm290_vm6 = vweird.f32 %v284_v42 }
 0x123   :  { %v297_v51 = vor.u32 1.1754944e-38, %v296_v46  ;;  %vm295_vm8 = vcmp.eq.f32.partialorder %v294_v48, 8.507059e+37 }
 0x127   :  { %v1622_v43 = vpop.eup %1621 }
 0x128   :  { %v286_v44 = vmul.f32 %v1622_v43, %v284_v42  ;;  %vm291_vm5 = vweird.f32 %v1622_v43 }
 0x129   :  { %vm292_vm7 = vmor %vm290_vm6, %vm291_vm5 }
 0x12a   :  { %v287_v45 = vsub.f32 1.0, %v286_v44  ;;  %v208_v44 = vpop.f32.mrf.mxu0 }
 0x12c   :  { %v288_v47 = vmul.f32 %v1622_v43, %v287_v45  ;;  %v209_v45 = vadd.f32 %v2006_v36, %v208_v44 }
 0x12e   :  { %v289_v49 = vadd.f32 %v1622_v43, %v288_v47 }
 0x130   :  { %v293_v52 = vsel %vm292_vm7, %v1622_v43, %v289_v49 }
 0x131   :  { %v298_v53 = vsel %vm295_vm8, %v297_v51, %v293_v52 }
 0x132   :  { %v308_v54 = vmul.f32 %v306_v50, %v298_v53 }
 0x134   :  { %310 = vrot.lane.b32.xlu2 %v308_v54, %s1852_s13 }
 0x18e   :  { %v311_v55 = vpop.permute.xlu2 %310 }
 0x18f   :  { %v313_v56 = vadd.f32 %v311_v55, %v207_v38 }
 0x191   :  { %1623 = vtanh.f32 %v313_v56 }
 0x197   :  { %v1624_v57 = vpop.eup %1623 }
 0x198   :  { %316 = vrot.lane.b32.xlu2 %v1624_v57, %s1852_s13 }
 0x1a0   :  { %256 = vperm.xlu2 %1613, %v254_v60  }
 0x1f2   :  { %v317_v58 = vpop.permute.xlu2 %316 }
 0x1f3   :  { %v319_v59 = vsub.f32 %v1960_v10, %v317_v58 }
 0x1f5   :  { %321 = vrot.lane.b32.xlu0 %v319_v59, %s1854_s24 }
 0x1fd   :  { %331 = vrot.lane.b32.xlu0 %v1960_v10, %s1852_s13  ;;  %v2042_v10 = vpop.permute.xlu2 %256 }
 0x1fe   :  { %vm279_vm9 = vcmp.gt.s32.totalorder %v2042_v10, 0  ;;  %vm448_vm3 = vcmp.gt.s32.totalorder %v2042_v10, 1 }
 0x205   :  { %412 = vrot.lane.b32.xlu0 %v1617_v4, %s1852_s13 }
 0x267   :  { %v322_v61 = vpop.permute.xlu0 %321 }
 0x268   :  { %v324_v62 = vmul.f32 %v322_v61, %v298_v53 }
 0x26a   :  { %326 = vrot.lane.b32.xlu1 %v324_v62, %s1854_s24 }
 0x26f   :  { %v332_v12 = vpop.permute.xlu0 %331 }
 0x277   :  { %v2064_v24 = vpop.permute.xlu0 %412 }
 0x278   :  { %v415_v27 = vadd.f32 %v2064_v24, %v388_v25 }
 0x2dc   :  { %v327_v11 = vpop.permute.xlu1 %326 }
 0x2dd   :  { %v329_v13 = vadd.f32 %v1624_v57, %v327_v11 }
 0x2df   :  { %v355_v14 = vpack.c.bf16 %v329_v13, %v329_v13  ;;  %v2047_v15 = vsel %vm279_vm9, %v329_v13, %v332_v12 }
 0x2e0   :  { %v335_v16 = vpack.c.bf16 %v2047_v15, %v2047_v15 }
 0x2e1   :  { %357 = vrot.lane.b32.xlu1 %v355_v14, %s1852_s13 }
 0x2e2   :  { %337 = vrot.lane.b32.xlu2 %v335_v16, %s1852_s13 }
 0x2e9   :  { %417 = vrot.lane.b32.xlu1 %v415_v27, %s1852_s13 }
 0x33c   :  { %v338_v23 = vpop.permute.xlu2 %337 }
 0x33d   :  { %1562 = vmatmul.msk.bf16.vlgmr.msra.gmra.mxu2 %vm262_vm1, %v338_v23 }
 0x33e   :  { %656 = vmatpush.bf16.msra.mxu2 %v1946_v6 }
 0x342   :  { %657 = vmatpush.bf16.msra.mxu2 %v1955_v9 }
 0x353   :  { %v358_v30 = vpop.permute.xlu1 %357 }
 0x354   :  { %1563 = vmatmul.msk.bf16.vlgmr.msra.gmra.mxu3 %vm262_vm1, %v358_v30 }
 0x355   :  { %676 = vmatpush.bf16.msra.mxu3 %v2053_v20 }
 0x359   :  { %677 = vmatpush.bf16.msra.mxu3 %v2056_v22 }
 0x35b   :  { %v418_v56 = vpop.permute.xlu1 %417 }
 0x3c0   :  { %v351_v31 = vpop.f32.mrf.mxu2 }
 0x3c1   :  { %v469_v33 = vadd.f32 %v351_v31, %v1999_v32  ;;  %v449_v46 = vadd.f32 %v351_v31, %v209_v45 }
 0x3c3   :  { %471 = vrot.lane.b32.xlu2 %v469_v33, %s1852_s13  ;;  %v1566_v49 = vmul.f32 -1.442695, %v449_v46 }
 0x3c8   :  { %v353_v34 = vpop.f32.mrf.mxu2 }
 0x3c9   :  { %v106_v34 = vld [vmem:[%s2470_s0 + $0x18] sm:$0xff] }
 0x3d7   :  { %v371_v37 = vpop.f32.mrf.mxu3 }
 0x3d8   :  { %v372_v38 = vadd.f32 %v2076_v35, %v371_v37 }
 0x3da   :  { %v392_v39 = vadd.f32 %v388_v25, %v372_v38 }
 0x3dc   :  { %v1565_v40 = vmul.f32 -1.442695, %v392_v39  ;;  %v105_v39 = vld [vmem:[%s2470_s0 + $0x10] sm:$0xff] }
 0x3de   :  { %1625 = vpow2.f32 %v1565_v40 }
 0x3df   :  { %v373_v41 = vpop.f32.mrf.mxu3 }
 0x3e4   :  { %v1626_v42 = vpop.eup %1625 }
 0x3e5   :  { %v396_v43 = vadd.f32 1.0, %v1626_v42 }
 0x3e7   :  { %1627 = vrcp.f32 %v396_v43  ;;  %v408_v51 = vand.u32 2147483648, %v396_v43  ;;  %v406_v53 = vand.u32 2147483647, %v396_v43  ;;  %vm402_vm11 = vweird.f32 %v396_v43 }
 0x3e8   :  { %1629 = vpow2.f32 %v1566_v49 }
 0x3e9   :  { %v409_v55 = vor.u32 1.1754944e-38, %v408_v51  ;;  %vm407_vm13 = vcmp.eq.f32.partialorder %v406_v53, 8.507059e+37 }
 0x3ed   :  { %v1628_v47 = vpop.eup %1627 }
 0x3ee   :  { %v398_v48 = vmul.f32 %v1628_v47, %v396_v43  ;;  %vm403_vm10 = vweird.f32 %v1628_v47  ;;  %v1630_v60 = vpop.eup %1629 }
 0x3ef   :  { %vm404_vm12 = vmor %vm402_vm11, %vm403_vm10  ;;  %v453_v61 = vadd.f32 1.0, %v1630_v60 }
 0x3f0   :  { %v399_v50 = vsub.f32 1.0, %v398_v48 }
 0x3f1   :  { %1631 = vrcp.f32 %v453_v61  ;;  %v465_v4 = vand.u32 2147483648, %v453_v61  ;;  %vm459_vm15 = vweird.f32 %v453_v61  ;;  %v463_v8 = vand.u32 2147483647, %v453_v61 }
 0x3f2   :  { %v400_v52 = vmul.f32 %v1628_v47, %v399_v50 }
 0x3f3   :  { %v466_v12 = vor.u32 1.1754944e-38, %v465_v4  ;;  %vm464_vm2 = vcmp.eq.f32.partialorder %v463_v8, 8.507059e+37 }
 0x3f4   :  { %v401_v54 = vadd.f32 %v1628_v47, %v400_v52 }
 0x3f6   :  { %v405_v57 = vsel %vm404_vm12, %v1628_v47, %v401_v54 }
 0x3f7   :  { %v410_v58 = vsel %vm407_vm13, %v409_v55, %v405_v57  ;;  %v1632_v62 = vpop.eup %1631 }
 0x3f8   :  { %v420_v59 = vmul.f32 %v418_v56, %v410_v58  ;;  %v455_v63 = vmul.f32 %v1632_v62, %v453_v61  ;;  %vm460_vm14 = vweird.f32 %v1632_v62 }
 0x3f9   :  { %vm461_vm0 = vmor %vm459_vm15, %vm460_vm14 }
 0x3fa   :  { %422 = vrot.lane.b32.xlu0 %v420_v59, %s1852_s13  ;;  %v456_v0 = vsub.f32 1.0, %v455_v63 }
 0x3fc   :  { %v457_v1 = vmul.f32 %v1632_v62, %v456_v0 }
 0x3fe   :  { %v458_v3 = vadd.f32 %v1632_v62, %v457_v1 }
 0x400   :  { %v462_v11 = vsel %vm461_vm0, %v1632_v62, %v458_v3  ;;  %vm598_vm0 = vcmp.gt.s32.totalorder %v2042_v10, 2 }
 0x401   :  { %v467_v14 = vsel %vm464_vm2, %v466_v12, %v462_v11 }
 0x41d   :  { %v472_v13 = vpop.permute.xlu2 %471 }
 0x41e   :  { %v474_v16 = vmul.f32 %v472_v13, %v467_v14 }
 0x420   :  { %476 = vrot.lane.b32.xlu1 %v474_v16, %s1852_s13 }
 0x46c   :  { %v423_v17 = vpop.permute.xlu0 %422 }
 0x46d   :  { %v425_v18 = vadd.f32 %v423_v17, %v372_v38 }
 0x46f   :  { %1633 = vtanh.f32 %v425_v18 }
 0x475   :  { %v1634_v19 = vpop.eup %1633 }
 0x476   :  { %428 = vrot.lane.b32.xlu2 %v1634_v19, %s1852_s13 }
 0x492   :  { %v477_v21 = vpop.permute.xlu1 %476 }
 0x493   :  { %v479_v23 = vadd.f32 %v477_v21, %v209_v45 }
 0x495   :  { %1635 = vtanh.f32 %v479_v23 }
 0x49b   :  { %v1636_v25 = vpop.eup %1635 }
 0x49c   :  { %v481_v27 = vsub.f32 %v2047_v15, %v1636_v25 }
 0x49e   :  { %483 = vrot.lane.b32.xlu0 %v481_v27, %s1855_s6 }
 0x4d0   :  { %v429_v29 = vpop.permute.xlu2 %428 }
 0x4d1   :  { %v431_v30 = vsub.f32 %v2027_v7, %v429_v29 }
 0x4d3   :  { %433 = vrot.lane.b32.xlu1 %v431_v30, %s1854_s24 }
 0x4db   :  { %443 = vrot.lane.b32.xlu1 %v2027_v7, %s1852_s13 }
 0x4e3   :  { %123 = vperm.xlu1 %1614, %v106_v34  }
 0x510   :  { %v484_v31 = vpop.permute.xlu0 %483 }
 0x511   :  { %v486_v33 = vmul.f32 %v484_v31, %v467_v14 }
 0x513   :  { %488 = vrot.lane.b32.xlu2 %v486_v33, %s1854_s24 }
 0x545   :  { %v434_v37 = vpop.permute.xlu1 %433 }
 0x546   :  { %v436_v38 = vmul.f32 %v434_v37, %v410_v58 }
 0x548   :  { %438 = vrot.lane.b32.xlu0 %v436_v38, %s1854_s24 }
 0x54d   :  { %v444_v44 = vpop.permute.xlu1 %443 }
 0x550   :  { %120 = vperm.xlu0 %1612, %v105_v39  }
 0x555   :  { %v124_v47 = vpop.permute.xlu1 %123 }
 0x556   :  { %vm140_vm5 = vcmp.eq.s32.totalorder %v124_v47, %v1992_v26 }
 0x557   :  { %v1550_v50 = vsel %vm140_vm5, 1.0, %v1853_v28 }
 0x56d   :  { %v489_v40 = vpop.permute.xlu2 %488 }
 0x56e   :  { %v491_v7 = vadd.f32 %v1636_v25, %v489_v40 }
 0x570   :  { %v2101_v41 = vsel %vm448_vm3, %v491_v7, %v2047_v15  ;;  %v513_v42 = vpack.c.bf16 %v491_v7, %v491_v7 }
 0x571   :  { %v493_v43 = vpack.c.bf16 %v2101_v41, %v2101_v41 }
 0x572   :  { %515 = vrot.lane.b32.xlu0 %v513_v42, %s1852_s13 }
 0x573   :  { %495 = vrot.lane.b32.xlu2 %v493_v43, %s1852_s13 }
 0x5ba   :  { %v439_v45 = vpop.permute.xlu0 %438 }
 0x5bb   :  { %v2107_v46 = vadd.f32 %v1634_v19, %v439_v45 }
 0x5bd   :  { %v2112_v48 = vsel %vm279_vm9, %v2107_v46, %v444_v44 }
 0x5be   :  { %v533_v15 = vpack.c.bf16 %v2112_v48, %v2112_v48 }
 0x5c0   :  { %535 = vrot.lane.b32.xlu2 %v533_v15, %s1852_s13 }
 0x5c2   :  { %v121_v49 = vpop.permute.xlu0 %120 }
 0x5c3   :  { %vm139_vm6 = vcmp.eq.s32.totalorder %v121_v49, %v1992_v26 }
 0x5c4   :  { %v1549_v51 = vsel %vm139_vm6, 1.0, %v1853_v28 }
 0x5c5   :  { %v162_v52 = vpack.c.bf16 %v1550_v50, %v1549_v51 }
 0x5c7   :  { %1556 = vmatmul.msk.bf16.gmra.mxu0 %vm180_vm4, %v162_v52 }
 0x5cd   :  { %v496_v53 = vpop.permute.xlu2 %495 }
 0x5ce   :  { %1567 = vmatmul.msk.bf16.vlgmr.msrb.gmra.mxu2 %vm262_vm1, %v496_v53 }
 0x5cf   :  { %806 = vmatpush.bf16.msrb.mxu2 %v1946_v6 }
 0x5d3   :  { %807 = vmatpush.bf16.msrb.mxu2 %v1955_v9 }
 0x5e4   :  { %v516_v54 = vpop.permute.xlu0 %515 }
 0x5e5   :  { %1568 = vmatmul.msk.bf16.vlgmr.msrb.gmra.mxu3 %vm262_vm1, %v516_v54 }
 0x5e6   :  { %826 = vmatpush.bf16.msrb.mxu3 %v2053_v20 }
 0x5ea   :  { %827 = vmatpush.bf16.msrb.mxu3 %v2056_v22 }
 0x61a   :  { %v536_v55 = vpop.permute.xlu2 %535 }
 0x61b   :  { %1569 = vmatmul.msk.bf16.vlgmr.msra.gmra.mxu1 %vm262_vm1, %v536_v55 }
 0x61c   :  { %846 = vmatpush.bf16.msra.mxu1 %v2019_v2 }
 0x620   :  { %847 = vmatpush.bf16.msra.mxu1 %v2022_v5 }
 0x644   :  { %v211_v61 = vpop.f32.mrf.mxu0 }
 0x645   :  { %v212_v62 = vadd.f32 %v2006_v36, %v211_v61 }
 0x651   :  { %v509_v56 = vpop.f32.mrf.mxu2 }
 0x652   :  { %v619_v57 = vadd.f32 %v509_v56, %v1999_v32  ;;  %v599_v63 = vadd.f32 %v509_v56, %v212_v62 }
 0x654   :  { %621 = vrot.lane.b32.xlu1 %v619_v57, %s1852_s13  ;;  %v1571_v1 = vmul.f32 -1.442695, %v599_v63 }
 0x656   :  { %1637 = vpow2.f32 %v1571_v1 }
 0x659   :  { %v511_v58 = vpop.f32.mrf.mxu2 }
 0x65c   :  { %v1638_v8 = vpop.eup %1637 }
 0x65d   :  { %v603_v11 = vadd.f32 1.0, %v1638_v8 }
 0x65f   :  { %1639 = vrcp.f32 %v603_v11  ;;  %v615_v18 = vand.u32 2147483648, %v603_v11  ;;  %vm609_vm8 = vweird.f32 %v603_v11  ;;  %v613_v19 = vand.u32 2147483647, %v603_v11 }
 0x661   :  { %v616_v27 = vor.u32 1.1754944e-38, %v615_v18  ;;  %vm614_vm11 = vcmp.eq.f32.partialorder %v613_v19, 8.507059e+37 }
 0x665   :  { %v1640_v12 = vpop.eup %1639 }
 0x666   :  { %v605_v13 = vmul.f32 %v1640_v12, %v603_v11  ;;  %vm610_vm7 = vweird.f32 %v1640_v12 }
 0x667   :  { %vm611_vm10 = vmor %vm609_vm8, %vm610_vm7 }
 0x668   :  { %v529_v59 = vpop.f32.mrf.mxu3  ;;  %v606_v14 = vsub.f32 1.0, %v605_v13 }
 0x669   :  { %v530_v21 = vadd.f32 %v2076_v35, %v529_v59 }
 0x66a   :  { %v607_v16 = vmul.f32 %v1640_v12, %v606_v14 }
 0x66c   :  { %v608_v17 = vadd.f32 %v1640_v12, %v607_v16 }
 0x66e   :  { %v612_v23 = vsel %vm611_vm10, %v1640_v12, %v608_v17 }
 0x66f   :  { %v617_v30 = vsel %vm614_vm11, %v616_v27, %v612_v23 }
 0x670   :  { %v531_v60 = vpop.f32.mrf.mxu3 }
 0x698   :  { %v549_v0 = vpop.f32.mrf.mxu1 }
 0x699   :  { %v573_v3 = vadd.f32 %v549_v0, %v2064_v24  ;;  %v553_v25 = vadd.f32 %v549_v0, %v530_v21 }
 0x69b   :  { %575 = vrot.lane.b32.xlu2 %v573_v3, %s1852_s13  ;;  %v1570_v33 = vmul.f32 -1.442695, %v553_v25 }
 0x69d   :  { %1641 = vpow2.f32 %v1570_v33 }
 0x6a0   :  { %v551_v4 = vpop.f32.mrf.mxu1 }
 0x6a3   :  { %v1642_v34 = vpop.eup %1641 }
 0x6a4   :  { %v557_v37 = vadd.f32 1.0, %v1642_v34 }
 0x6a6   :  { %1643 = vrcp.f32 %v557_v37  ;;  %v569_v43 = vand.u32 2147483648, %v557_v37  ;;  %vm563_vm13 = vweird.f32 %v557_v37  ;;  %v567_v44 = vand.u32 2147483647, %v557_v37 }
 0x6a8   :  { %v570_v47 = vor.u32 1.1754944e-38, %v569_v43  ;;  %vm568_vm15 = vcmp.eq.f32.partialorder %v567_v44, 8.507059e+37 }
 0x6ac   :  { %v1644_v38 = vpop.eup %1643 }
 0x6ad   :  { %v559_v39 = vmul.f32 %v1644_v38, %v557_v37  ;;  %vm564_vm12 = vweird.f32 %v1644_v38 }
 0x6ae   :  { %vm565_vm14 = vmor %vm563_vm13, %vm564_vm12  ;;  %vm748_vm13 = vcmp.gt.s32.totalorder %v2042_v10, 3 }
 0x6af   :  { %v560_v40 = vsub.f32 1.0, %v559_v39 }
 0x6b1   :  { %v561_v7 = vmul.f32 %v1644_v38, %v560_v40 }
 0x6b3   :  { %v562_v42 = vadd.f32 %v1644_v38, %v561_v7 }
 0x6b5   :  { %v566_v45 = vsel %vm565_vm14, %v1644_v38, %v562_v42 }
 0x6b6   :  { %v571_v49 = vsel %vm568_vm15, %v570_v47, %v566_v45 }
 0x6c6   :  { %v622_v29 = vpop.permute.xlu1 %621 }
 0x6c7   :  { %v624_v31 = vmul.f32 %v622_v29, %v617_v30  ;;  %v213_v29 = vpop.f32.mrf.mxu0 }
 0x6c9   :  { %626 = vrot.lane.b32.xlu0 %v624_v31, %s1852_s13 }
 0x6f5   :  { %v576_v15 = vpop.permute.xlu2 %575 }
 0x6f6   :  { %v578_v50 = vmul.f32 %v576_v15, %v571_v49 }
 0x6f8   :  { %580 = vrot.lane.b32.xlu1 %v578_v50, %s1852_s13 }
 0x73b   :  { %v627_v51 = vpop.permute.xlu0 %626 }
 0x73c   :  { %v629_v52 = vadd.f32 %v627_v51, %v212_v62 }
 0x73e   :  { %1645 = vtanh.f32 %v629_v52 }
 0x744   :  { %v1646_v53 = vpop.eup %1645 }
 0x745   :  { %v631_v54 = vsub.f32 %v2101_v41, %v1646_v53 }
 0x747   :  { %633 = vrot.lane.b32.xlu2 %v631_v54, %s1855_s6 }
 0x76a   :  { %v581_v55 = vpop.permute.xlu1 %580 }
 0x76b   :  { %v583_v56 = vadd.f32 %v581_v55, %v530_v21 }
 0x76d   :  { %1647 = vtanh.f32 %v583_v56 }
 0x773   :  { %v1648_v57 = vpop.eup %1647 }
 0x774   :  { %v585_v58 = vsub.f32 %v2112_v48, %v1648_v57 }
 0x776   :  { %587 = vrot.lane.b32.xlu0 %v585_v58, %s1855_s6 }
 0x7a1   :  { %v634_v59 = vpop.permute.xlu2 %633 }
 0x7a2   :  { %v636_v60 = vmul.f32 %v634_v59, %v617_v30  ;;  %v214_v30 = vadd.f32 %v2006_v36, %v213_v29 }
 0x7a4   :  { %638 = vrot.lane.b32.xlu1 %v636_v60, %s1854_s24 }
 0x7e8   :  { %v588_v61 = vpop.permute.xlu0 %587 }
 0x7e9   :  { %v590_v62 = vmul.f32 %v588_v61, %v571_v49 }
 0x7eb   :  { %592 = vrot.lane.b32.xlu2 %v590_v62, %s1854_s24 }
 0x816   :  { %v639_v63 = vpop.permute.xlu1 %638 }
 0x817   :  { %v641_v0 = vadd.f32 %v1646_v53, %v639_v63 }
 0x819   :  { %v2149_v1 = vsel %vm598_vm0, %v641_v0, %v2101_v41  ;;  %v663_v3 = vpack.c.bf16 %v641_v0, %v641_v0 }
 0x81a   :  { %v643_v4 = vpack.c.bf16 %v2149_v1, %v2149_v1 }
 0x81b   :  { %665 = vrot.lane.b32.xlu2 %v663_v3, %s1852_s13 }
 0x81c   :  { %645 = vrot.lane.b32.xlu0 %v643_v4, %s1852_s13 }
 0x845   :  { %v593_v8 = vpop.permute.xlu2 %592 }
 0x846   :  { %v2155_v11 = vadd.f32 %v1648_v57, %v593_v8 }
 0x848   :  { %v2161_v12 = vsel %vm448_vm3, %v2155_v11, %v2112_v48 }
 0x849   :  { %v683_v41 = vpack.c.bf16 %v2161_v12, %v2161_v12 }
 0x84b   :  { %685 = vrot.lane.b32.xlu1 %v683_v41, %s1852_s13 }
 0x875   :  { %v666_v13 = vpop.permute.xlu2 %665 }
 0x876   :  { %1573 = vmatmul.msk.bf16.vlgmr.msra.gmra.mxu3 %vm262_vm1, %v666_v13 }
 0x877   :  { %976 = vmatpush.bf16.msra.mxu3 %v2053_v20 }
 0x87b   :  { %977 = vmatpush.bf16.msra.mxu3 %v2056_v22 }
 0x88e   :  { %v646_v14 = vpop.permute.xlu0 %645 }
 0x88f   :  { %1572 = vmatmul.msk.bf16.vlgmr.msra.gmra.mxu2 %vm262_vm1, %v646_v14 }
 0x890   :  { %956 = vmatpush.bf16.msra.mxu2 %v1946_v6 }
 0x894   :  { %957 = vmatpush.bf16.msra.mxu2 %v1955_v9 }
 0x8bd   :  { %v686_v48 = vpop.permute.xlu1 %685 }
 0x8be   :  { %1574 = vmatmul.msk.bf16.vlgmr.msrb.gmra.mxu1 %vm262_vm1, %v686_v48 }
 0x8bf   :  { %1106 = vmatpush.bf16.msrb.mxu1 %v1946_v6 }
 0x8c3   :  { %1107 = vmatpush.bf16.msrb.mxu1 %v1955_v9 }
 0x8f9   :  { %v679_v16 = vpop.f32.mrf.mxu3 }
 0x8fa   :  { %v680_v40 = vadd.f32 %v2076_v35, %v679_v16 }
 0x901   :  { %v681_v17 = vpop.f32.mrf.mxu3 }
 0x912   :  { %v659_v18 = vpop.f32.mrf.mxu2 }
 0x913   :  { %v769_v19 = vadd.f32 %v659_v18, %v1999_v32  ;;  %v749_v6 = vadd.f32 %v659_v18, %v214_v30 }
 0x915   :  { %771 = vrot.lane.b32.xlu0 %v769_v19, %s1852_s13  ;;  %v1576_v31 = vmul.f32 -1.442695, %v749_v6 }
 0x917   :  { %1649 = vpow2.f32 %v1576_v31  ;;  %v107_v31 = vld [vmem:[%s2470_s0 + $0x20] sm:$0xff] }
 0x91a   :  { %v661_v21 = vpop.f32.mrf.mxu2 }
 0x91d   :  { %v1650_v9 = vpop.eup %1649 }
 0x91e   :  { %v753_v33 = vadd.f32 1.0, %v1650_v9 }
 0x920   :  { %1651 = vrcp.f32 %v753_v33  ;;  %v765_v43 = vand.u32 2147483648, %v753_v33  ;;  %vm759_vm5 = vweird.f32 %v753_v33  ;;  %v763_v44 = vand.u32 2147483647, %v753_v33 }
 0x922   :  { %v766_v15 = vor.u32 1.1754944e-38, %v765_v43  ;;  %vm764_vm7 = vcmp.eq.f32.partialorder %v763_v44, 8.507059e+37 }
 0x926   :  { %v1652_v34 = vpop.eup %1651 }
 0x927   :  { %v755_v37 = vmul.f32 %v1652_v34, %v753_v33  ;;  %vm760_vm2 = vweird.f32 %v1652_v34 }
 0x928   :  { %vm761_vm6 = vmor %vm759_vm5, %vm760_vm2 }
 0x929   :  { %v756_v38 = vsub.f32 1.0, %v755_v37  ;;  %v108_v37 = vld [vmem:[%s2470_s0 + $0x28] sm:$0xff] }
 0x92b   :  { %v757_v39 = vmul.f32 %v1652_v34, %v756_v38 }
 0x92d   :  { %v758_v42 = vadd.f32 %v1652_v34, %v757_v39 }
 0x92f   :  { %v762_v47 = vsel %vm761_vm6, %v1652_v34, %v758_v42 }
 0x930   :  { %v767_v50 = vsel %vm764_vm7, %v766_v15, %v762_v47 }
 0x93b   :  { %v699_v23 = vpop.f32.mrf.mxu1 }
 0x93c   :  { %v723_v25 = vadd.f32 %v699_v23, %v2064_v24  ;;  %v703_v7 = vadd.f32 %v699_v23, %v680_v40 }
 0x93e   :  { %725 = vrot.lane.b32.xlu1 %v723_v25, %s1852_s13  ;;  %v1575_v45 = vmul.f32 -1.442695, %v703_v7 }
 0x940   :  { %1653 = vpow2.f32 %v1575_v45 }
 0x943   :  { %v701_v27 = vpop.f32.mrf.mxu1 }
 0x946   :  { %v1654_v52 = vpop.eup %1653 }
 0x947   :  { %v707_v53 = vadd.f32 1.0, %v1654_v52 }
 0x949   :  { %1655 = vrcp.f32 %v707_v53  ;;  %v719_v59 = vand.u32 2147483648, %v707_v53  ;;  %vm713_vm10 = vweird.f32 %v707_v53  ;;  %v717_v60 = vand.u32 2147483647, %v707_v53 }
 0x94b   :  { %v720_v62 = vor.u32 1.1754944e-38, %v719_v59  ;;  %vm718_vm12 = vcmp.eq.f32.partialorder %v717_v60, 8.507059e+37 }
 0x94f   :  { %v1656_v54 = vpop.eup %1655 }
 0x950   :  { %v709_v55 = vmul.f32 %v1656_v54, %v707_v53  ;;  %vm714_vm8 = vweird.f32 %v1656_v54 }
 0x951   :  { %vm715_vm11 = vmor %vm713_vm10, %vm714_vm8 }
 0x952   :  { %v710_v56 = vsub.f32 1.0, %v709_v55 }
 0x954   :  { %v711_v57 = vmul.f32 %v1656_v54, %v710_v56 }
 0x956   :  { %v712_v58 = vadd.f32 %v1656_v54, %v711_v57 }
 0x958   :  { %v716_v61 = vsel %vm715_vm11, %v1656_v54, %v712_v58 }
 0x959   :  { %v721_v0 = vsel %vm718_vm12, %v720_v62, %v716_v61 }
 0x987   :  { %v772_v49 = vpop.permute.xlu0 %771 }
 0x988   :  { %v774_v51 = vmul.f32 %v772_v49, %v767_v50 }
 0x98a   :  { %776 = vrot.lane.b32.xlu2 %v774_v51, %s1852_s13 }
 0x9b0   :  { %v726_v63 = vpop.permute.xlu1 %725 }
 0x9b1   :  { %v728_v3 = vmul.f32 %v726_v63, %v721_v0 }
 0x9b3   :  { %730 = vrot.lane.b32.xlu0 %v728_v3, %s1852_s13 }
 0x9e4   :  { %v777_v4 = vpop.permute.xlu2 %776 }
 0x9e5   :  { %v779_v8 = vadd.f32 %v777_v4, %v214_v30 }
 0x9e7   :  { %1657 = vtanh.f32 %v779_v8 }
 0x9ed   :  { %v1658_v41 = vpop.eup %1657 }
 0x9ee   :  { %v781_v13 = vsub.f32 %v2149_v1, %v1658_v41 }
 0x9f0   :  { %783 = vrot.lane.b32.xlu1 %v781_v13, %s1855_s6 }
 0xa25   :  { %v731_v14 = vpop.permute.xlu0 %730 }
 0xa26   :  { %v733_v48 = vadd.f32 %v731_v14, %v680_v40 }
 0xa28   :  { %1659 = vtanh.f32 %v733_v48 }
 0xa2e   :  { %v1660_v16 = vpop.eup %1659 }
 0xa2f   :  { %v735_v17 = vsub.f32 %v2161_v12, %v1660_v16 }
 0xa31   :  { %737 = vrot.lane.b32.xlu2 %v735_v17, %s1855_s6 }
 0xa62   :  { %v784_v18 = vpop.permute.xlu1 %783 }
 0xa63   :  { %v786_v19 = vmul.f32 %v784_v18, %v767_v50 }
 0xa65   :  { %788 = vrot.lane.b32.xlu0 %v786_v19, %s1854_s24 }
 0xa8b   :  { %v738_v21 = vpop.permute.xlu2 %737 }
 0xa8c   :  { %v740_v23 = vmul.f32 %v738_v21, %v721_v0 }
 0xa8e   :  { %742 = vrot.lane.b32.xlu1 %v740_v23, %s1854_s24 }
 0xad7   :  { %v789_v25 = vpop.permute.xlu0 %788 }
 0xad8   :  { %v791_v27 = vadd.f32 %v1658_v41, %v789_v25 }
 0xada   :  { %v2193_v29 = vsel %vm748_vm13, %v791_v27, %v2149_v1  ;;  %v813_v30 = vpack.c.bf16 %v791_v27, %v791_v27 }
 0xadb   :  { %v793_v6 = vpack.c.bf16 %v2193_v29, %v2193_v29 }
 0xadc   :  { %815 = vrot.lane.b32.xlu1 %v813_v30, %s1852_s13 }
 0xadd   :  { %795 = vrot.lane.b32.xlu2 %v793_v6, %s1852_s13 }
 0xae5   :  { %126 = vperm.xlu2 %1613, %v107_v31  }
 0xb00   :  { %v743_v9 = vpop.permute.xlu1 %742 }
 0xb01   :  { %v2202_v33 = vadd.f32 %v1660_v16, %v743_v9 }
 0xb03   :  { %v2208_v1 = vsel %vm598_vm0, %v2202_v33, %v2161_v12 }
 0xb04   :  { %v833_v34 = vpack.c.bf16 %v2208_v1, %v2208_v1 }
 0xb06   :  { %835 = vrot.lane.b32.xlu0 %v833_v34, %s1852_s13 }
 0xb0e   :  { %129 = vperm.xlu0 %1612, %v108_v37  }
 0xb37   :  { %v796_v38 = vpop.permute.xlu2 %795 }
 0xb38   :  { %1577 = vmatmul.msk.bf16.vlgmr.msrb.gmra.mxu2 %vm262_vm1, %v796_v38 }
 0xb39   :  { %1126 = vmatpush.bf16.msrb.mxu2 %v2053_v20 }
 0xb3d   :  { %1127 = vmatpush.bf16.msrb.mxu2 %v2056_v22 }
 0xb3f   :  { %v127_v40 = vpop.permute.xlu2 %126 }
 0xb40   :  { %vm141_vm14 = vcmp.eq.s32.totalorder %v127_v40, %v1992_v26 }
 0xb41   :  { %v1551_v42 = vsel %vm141_vm14, 1.0, %v1853_v28  ;;  %vm898_vm14 = vcmp.gt.s32.totalorder %v2042_v10, 4 }
 0xb4e   :  { %v816_v39 = vpop.permute.xlu1 %815 }
 0xb4f   :  { %1578 = vmatmul.msk.bf16.vlgmr.msrb.gmra.mxu3 %vm262_vm1, %v816_v39 }
 0xb50   :  { %1146 = vmatpush.bf16.msrb.mxu3 %v2019_v2 }
 0xb54   :  { %1147 = vmatpush.bf16.msrb.mxu3 %v2022_v5 }
 0xb78   :  { %v836_v12 = vpop.permute.xlu0 %835 }
 0xb79   :  { %1579 = vmatmul.msk.bf16.vlgmr.msra.gmra.mxu1 %vm262_vm1, %v836_v12 }
 0xb7a   :  { %1276 = vmatpush.bf16.msra.mxu1 %v2053_v20 }
 0xb7e   :  { %1277 = vmatpush.bf16.msra.mxu1 %v2056_v22 }
 0xb80   :  { %v130_v7 = vpop.permute.xlu0 %129 }
 0xb81   :  { %vm142_vm15 = vcmp.eq.s32.totalorder %v130_v7, %v1992_v26 }
 0xb82   :  { %v1552_v43 = vsel %vm142_vm15, 1.0, %v1853_v28 }
 0xb83   :  { %v163_v44 = vpack.c.bf16 %v1552_v43, %v1551_v42  ;;  %v109_v43 = vld [vmem:[%s2470_s0 + $0x30] sm:$0xff] }
 0xb85   :  { %1557 = vmatmul.msk.bf16.gmra.mxu0 %vm180_vm4, %v163_v44 }
 0xbbb   :  { %v809_v45 = vpop.f32.mrf.mxu2 }
 0xbbc   :  { %v919_v47 = vadd.f32 %v809_v45, %v1999_v32 }
 0xbbe   :  { %921 = vrot.lane.b32.xlu2 %v919_v47, %s1852_s13 }
 0xbc3   :  { %v811_v15 = vpop.f32.mrf.mxu2 }
 0xbd2   :  { %v829_v49 = vpop.f32.mrf.mxu3 }
 0xbd3   :  { %v830_v48 = vadd.f32 %v2076_v35, %v829_v49 }
 0xbda   :  { %v831_v50 = vpop.f32.mrf.mxu3 }
 0xbf6   :  { %v849_v51 = vpop.f32.mrf.mxu1 }
 0xbf7   :  { %v873_v52 = vadd.f32 %v849_v51, %v2064_v24  ;;  %v853_v16 = vadd.f32 %v849_v51, %v830_v48 }
 0xbf9   :  { %875 = vrot.lane.b32.xlu1 %v873_v52, %s1852_s13  ;;  %v1580_v17 = vmul.f32 -1.442695, %v853_v16 }
 0xbfe   :  { %v851_v53 = vpop.f32.mrf.mxu1 }
 0xbff   :  { %v110_v53 = vld [vmem:[%s2470_s0 + $0x38] sm:$0xff] }
 0xc02   :  { %v216_v54 = vpop.f32.mrf.mxu0 }
 0xc03   :  { %v217_v55 = vadd.f32 %v2006_v36, %v216_v54 }
 0xc05   :  { %v899_v56 = vadd.f32 %v809_v45, %v217_v55 }
 0xc07   :  { %v1581_v57 = vmul.f32 -1.442695, %v899_v56 }
 0xc09   :  { %1661 = vpow2.f32 %v1581_v57 }
 0xc0f   :  { %v1662_v58 = vpop.eup %1661 }
 0xc10   :  { %v903_v59 = vadd.f32 1.0, %v1662_v58 }
 0xc12   :  { %1663 = vrcp.f32 %v903_v59  ;;  %v915_v63 = vand.u32 2147483648, %v903_v59  ;;  %v913_v3 = vand.u32 2147483647, %v903_v59  ;;  %vm909_vm5 = vweird.f32 %v903_v59 }
 0xc13   :  { %1665 = vpow2.f32 %v1580_v17 }
 0xc14   :  { %v916_v8 = vor.u32 1.1754944e-38, %v915_v63  ;;  %vm914_vm7 = vcmp.eq.f32.partialorder %v913_v3, 8.507059e+37 }
 0xc18   :  { %v1664_v60 = vpop.eup %1663  ;;  %v922_v36 = vpop.permute.xlu2 %921 }
 0xc19   :  { %v905_v61 = vmul.f32 %v1664_v60, %v903_v59  ;;  %vm910_vm2 = vweird.f32 %v1664_v60  ;;  %v1666_v18 = vpop.eup %1665 }
 0xc1a   :  { %vm911_vm6 = vmor %vm909_vm5, %vm910_vm2  ;;  %v857_v19 = vadd.f32 1.0, %v1666_v18 }
 0xc1b   :  { %v906_v62 = vsub.f32 1.0, %v905_v61 }
 0xc1c   :  { %1667 = vrcp.f32 %v857_v19  ;;  %v869_v6 = vand.u32 2147483648, %v857_v19  ;;  %vm863_vm10 = vweird.f32 %v857_v19  ;;  %v867_v31 = vand.u32 2147483647, %v857_v19 }
 0xc1d   :  { %v907_v0 = vmul.f32 %v1664_v60, %v906_v62 }
 0xc1e   :  { %v870_v34 = vor.u32 1.1754944e-38, %v869_v6  ;;  %vm868_vm12 = vcmp.eq.f32.partialorder %v867_v31, 8.507059e+37 }
 0xc1f   :  { %v908_v4 = vadd.f32 %v1664_v60, %v907_v0 }
 0xc21   :  { %v912_v41 = vsel %vm911_vm6, %v1664_v60, %v908_v4 }
 0xc22   :  { %v917_v13 = vsel %vm914_vm7, %v916_v8, %v912_v41  ;;  %v1668_v21 = vpop.eup %1667 }
 0xc23   :  { %v924_v14 = vmul.f32 %v922_v36, %v917_v13  ;;  %v859_v23 = vmul.f32 %v1668_v21, %v857_v19  ;;  %vm864_vm8 = vweird.f32 %v1668_v21 }
 0xc24   :  { %vm865_vm11 = vmor %vm863_vm10, %vm864_vm8 }
 0xc25   :  { %926 = vrot.lane.b32.xlu1 %v924_v14, %s1852_s13  ;;  %v860_v25 = vsub.f32 1.0, %v859_v23  ;;  %v218_v14 = vpop.f32.mrf.mxu0 }
 0xc27   :  { %v861_v27 = vmul.f32 %v1668_v21, %v860_v25 }
 0xc29   :  { %v862_v30 = vadd.f32 %v1668_v21, %v861_v27 }
 0xc2b   :  { %v866_v9 = vsel %vm865_vm11, %v1668_v21, %v862_v30 }
 0xc2c   :  { %v871_v37 = vsel %vm868_vm12, %v870_v34, %v866_v9 }
 0xc6b   :  { %v876_v38 = vpop.permute.xlu1 %875 }
 0xc6c   :  { %v878_v39 = vmul.f32 %v876_v38, %v871_v37 }
 0xc6e   :  { %880 = vrot.lane.b32.xlu0 %v878_v39, %s1852_s13 }
 0xc97   :  { %v927_v12 = vpop.permute.xlu1 %926 }
 0xc98   :  { %v929_v40 = vadd.f32 %v927_v12, %v217_v55 }
 0xc9a   :  { %1669 = vtanh.f32 %v929_v40 }
 0xca0   :  { %v1670_v7 = vpop.eup %1669 }
 0xca1   :  { %v931_v42 = vsub.f32 %v2193_v29, %v1670_v7 }
 0xca3   :  { %933 = vrot.lane.b32.xlu0 %v931_v42, %s1855_s6 }
 0xcab   :  { %132 = vperm.xlu0 %1612, %v109_v43  }
 0xce0   :  { %v881_v44 = vpop.permute.xlu0 %880 }
 0xce1   :  { %v883_v45 = vadd.f32 %v881_v44, %v830_v48 }
 0xce3   :  { %1671 = vtanh.f32 %v883_v45 }
 0xce9   :  { %v1672_v47 = vpop.eup %1671 }
 0xcea   :  { %v885_v15 = vsub.f32 %v2208_v1, %v1672_v47 }
 0xcec   :  { %887 = vrot.lane.b32.xlu2 %v885_v15, %s1855_s6 }
 0xd15   :  { %v934_v49 = vpop.permute.xlu0 %933 }
 0xd16   :  { %v936_v50 = vmul.f32 %v934_v49, %v917_v13 }
 0xd18   :  { %938 = vrot.lane.b32.xlu2 %v936_v50, %s1854_s24 }
 0xd1d   :  { %v133_v62 = vpop.permute.xlu0 %132 }
 0xd1e   :  { %vm143_vm15 = vcmp.eq.s32.totalorder %v133_v62, %v1992_v26 }
 0xd1f   :  { %v1553_v0 = vsel %vm143_vm15, 1.0, %v1853_v28  ;;  %vm1048_vm15 = vcmp.gt.s32.totalorder %v2042_v10, 5 }
 0xd46   :  { %v888_v51 = vpop.permute.xlu2 %887 }
 0xd47   :  { %v890_v52 = vmul.f32 %v888_v51, %v871_v37 }
 0xd49   :  { %892 = vrot.lane.b32.xlu1 %v890_v52, %s1854_s24 }
 0xd51   :  { %135 = vperm.xlu1 %1614, %v110_v53  }
 0xd72   :  { %v939_v54 = vpop.permute.xlu2 %938 }
 0xd73   :  { %v941_v55 = vadd.f32 %v1670_v7, %v939_v54 }
 0xd75   :  { %v2254_v56 = vsel %vm898_vm14, %v941_v55, %v2193_v29  ;;  %v963_v57 = vpack.c.bf16 %v941_v55, %v941_v55 }
 0xd76   :  { %v943_v58 = vpack.c.bf16 %v2254_v56, %v2254_v56 }
 0xd77   :  { %965 = vrot.lane.b32.xlu0 %v963_v57, %s1852_s13 }
 0xd78   :  { %945 = vrot.lane.b32.xlu1 %v943_v58, %s1852_s13 }
 0xdbb   :  { %v893_v59 = vpop.permute.xlu1 %892 }
 0xdbc   :  { %v2260_v60 = vadd.f32 %v1672_v47, %v893_v59 }
 0xdbe   :  { %v2266_v61 = vsel %vm748_vm13, %v2260_v60, %v2208_v1 }
 0xdbf   :  { %v983_v29 = vpack.c.bf16 %v2266_v61, %v2266_v61 }
 0xdc1   :  { %985 = vrot.lane.b32.xlu2 %v983_v29, %s1852_s13 }
 0xdc3   :  { %v136_v63 = vpop.permute.xlu1 %135 }
 0xdc4   :  { %vm144_vm2 = vcmp.eq.s32.totalorder %v136_v63, %v1992_v26 }
 0xdc5   :  { %v1554_v3 = vsel %vm144_vm2, 1.0, %v1853_v28 }
 0xdc6   :  { %v164_v4 = vpack.c.bf16 %v1554_v3, %v1553_v0 }
 0xdc8   :  { %1558 = vmatmul.msk.bf16.gmra.mxu0 %vm180_vm4, %v164_v4 }
 0xde9   :  { %v966_v1 = vpop.permute.xlu0 %965 }
 0xdea   :  { %1583 = vmatmul.msk.bf16.vlgmr.msra.gmra.mxu3 %vm262_vm1, %v966_v1  ;;  %v946_v8 = vpop.permute.xlu1 %945 }
 0xdeb   :  { %1582 = vmatmul.msk.bf16.vlgmr.msra.gmra.mxu2 %vm262_vm1, %v946_v8  ;;  %1406 = vmatpush.bf16.msra.mxu3 %v2053_v20 }
 0xdec   :  { %1296 = vmatpush.bf16.msra.mxu2 %v2019_v2 }
 0xdef   :  { %1407 = vmatpush.bf16.msra.mxu3 %v2056_v22 }
 0xdf0   :  { %1297 = vmatpush.bf16.msra.mxu2 %v2022_v5 }
 0xe1b   :  { %v986_v26 = vpop.permute.xlu2 %985 }
 0xe1c   :  { %1584 = vmatmul.msk.bf16.vlgmr.msrb.gmra.mxu0 %vm262_vm1, %v986_v26 }
 0xe1d   :  { %1426 = vmatpush.bf16.msrb.mxu0 %v2019_v2 }
 0xe21   :  { %1427 = vmatpush.bf16.msrb.mxu0 %v2022_v5  ;;  %v2296_v5 = vld [vmem:[%s2475_s5] ss:$0 sm:$0xff] }
 0xe22   :  { %v219_v18 = vadd.f32 %v2296_v5, %v218_v14 }
 0xe45   :  { %v2287_v48 = vpop.f32.mrf.mxu0 }
 0xe4d   :  { %v2289_v22 = vpop.f32.mrf.mxu0 }
 0xe6d   :  { %v979_v28 = vpop.f32.mrf.mxu3 }
 0xe6e   :  { %v959_v41 = vpop.f32.mrf.mxu2  ;;  %v980_v25 = vadd.f32 %v2076_v35, %v979_v28 }
 0xe6f   :  { %v1069_v36 = vadd.f32 %v959_v41, %v1999_v32  ;;  %v1049_v19 = vadd.f32 %v959_v41, %v219_v18 }
 0xe71   :  { %1071 = vrot.lane.b32.xlu0 %v1069_v36, %s1852_s13  ;;  %v1586_v21 = vmul.f32 -1.442695, %v1049_v19 }
 0xe73   :  { %1673 = vpow2.f32 %v1586_v21 }
 0xe75   :  { %v981_v20 = vpop.f32.mrf.mxu3 }
 0xe76   :  { %v961_v13 = vpop.f32.mrf.mxu2 }
 0xe79   :  { %v1674_v23 = vpop.eup %1673 }
 0xe7a   :  { %v1053_v27 = vadd.f32 1.0, %v1674_v23 }
 0xe7c   :  { %1675 = vrcp.f32 %v1053_v27  ;;  %v1065_v40 = vand.u32 2147483648, %v1053_v27  ;;  %vm1059_vm5 = vweird.f32 %v1053_v27  ;;  %v1063_v7 = vand.u32 2147483647, %v1053_v27 }
 0xe7e   :  { %v1066_v43 = vor.u32 1.1754944e-38, %v1065_v40  ;;  %vm1064_vm7 = vcmp.eq.f32.partialorder %v1063_v7, 8.507059e+37 }
 0xe82   :  { %v1676_v31 = vpop.eup %1675 }
 0xe83   :  { %v1055_v9 = vmul.f32 %v1676_v31, %v1053_v27  ;;  %vm1060_vm4 = vweird.f32 %v1676_v31 }
 0xe84   :  { %vm1061_vm6 = vmor %vm1059_vm5, %vm1060_vm4 }
 0xe85   :  { %v1056_v37 = vsub.f32 1.0, %v1055_v9 }
 0xe87   :  { %v1057_v39 = vmul.f32 %v1676_v31, %v1056_v37 }
 0xe89   :  { %v1058_v12 = vadd.f32 %v1676_v31, %v1057_v39 }
 0xe8b   :  { %v1062_v35 = vsel %vm1061_vm6, %v1676_v31, %v1058_v12 }
 0xe8c   :  { %v1067_v45 = vsel %vm1064_vm7, %v1066_v43, %v1062_v35 }
 0xe99   :  { %v999_v16 = vpop.f32.mrf.mxu0 }
 0xe9a   :  { %v1023_v17 = vadd.f32 %v999_v16, %v2064_v24  ;;  %v1003_v30 = vadd.f32 %v999_v16, %v980_v25 }
 0xe9c   :  { %1025 = vrot.lane.b32.xlu2 %v1023_v17, %s1852_s13  ;;  %v1585_v6 = vmul.f32 -1.442695, %v1003_v30 }
 0xe9e   :  { %1677 = vpow2.f32 %v1585_v6 }
 0xea1   :  { %v1001_v2 = vpop.f32.mrf.mxu0 }
 0xea4   :  { %v1678_v34 = vpop.eup %1677 }
 0xea5   :  { %v1007_v38 = vadd.f32 1.0, %v1678_v34 }
 0xea7   :  { %1679 = vrcp.f32 %v1007_v38  ;;  %v1019_v52 = vand.u32 2147483648, %v1007_v38  ;;  %vm1013_vm10 = vweird.f32 %v1007_v38  ;;  %v1017_v53 = vand.u32 2147483647, %v1007_v38 }
 0xea9   :  { %v1020_v55 = vor.u32 1.1754944e-38, %v1019_v52  ;;  %vm1018_vm12 = vcmp.eq.f32.partialorder %v1017_v53, 8.507059e+37 }
 0xead   :  { %v1680_v42 = vpop.eup %1679 }
 0xeae   :  { %v1009_v47 = vmul.f32 %v1680_v42, %v1007_v38  ;;  %vm1014_vm8 = vweird.f32 %v1680_v42  ;;  %v222_v38 = vadd.f32 %v2296_v5, %v2287_v48  ;;  %v2341_v48 = vld [vmem:[%s2479_s9] ss:$0 sm:$0xff] }
 0xeaf   :  { %vm1015_vm11 = vmor %vm1013_vm10, %vm1014_vm8 }
 0xeb0   :  { %v1010_v49 = vsub.f32 1.0, %v1009_v47 }
 0xeb2   :  { %v1011_v50 = vmul.f32 %v1680_v42, %v1010_v49 }
 0xeb4   :  { %v1012_v51 = vadd.f32 %v1680_v42, %v1011_v50 }
 0xeb6   :  { %v1016_v54 = vsel %vm1015_vm11, %v1680_v42, %v1012_v51 }
 0xeb7   :  { %v1021_v58 = vsel %vm1018_vm12, %v1020_v55, %v1016_v54  ;;  %vm1198_vm12 = vcmp.gt.s32.totalorder %v2042_v10, 6 }
 0xee3   :  { %v1072_v44 = vpop.permute.xlu0 %1071 }
 0xee4   :  { %v1074_v15 = vmul.f32 %v1072_v44, %v1067_v45 }
 0xee6   :  { %1076 = vrot.lane.b32.xlu2 %v1074_v15, %s1852_s13 }
 0xef6   :  { %v1026_v57 = vpop.permute.xlu2 %1025 }
 0xef7   :  { %v1028_v59 = vmul.f32 %v1026_v57, %v1021_v58 }
 0xef9   :  { %1030 = vrot.lane.b32.xlu1 %v1028_v59, %s1852_s13 }
 0xf40   :  { %v1077_v62 = vpop.permute.xlu2 %1076 }
 0xf41   :  { %v1079_v29 = vadd.f32 %v1077_v62, %v219_v18 }
 0xf43   :  { %1681 = vtanh.f32 %v1079_v29 }
 0xf49   :  { %v1682_v63 = vpop.eup %1681 }
 0xf4a   :  { %v1081_v0 = vsub.f32 %v2254_v56, %v1682_v63 }
 0xf4c   :  { %1083 = vrot.lane.b32.xlu1 %v1081_v0, %s1855_s6 }
 0xf6b   :  { %v1031_v3 = vpop.permute.xlu1 %1030 }
 0xf6c   :  { %v1033_v4 = vadd.f32 %v1031_v3, %v980_v25 }
 0xf6e   :  { %1683 = vtanh.f32 %v1033_v4 }
 0xf74   :  { %v1684_v1 = vpop.eup %1683 }
 0xf75   :  { %v1035_v8 = vsub.f32 %v2266_v61, %v1684_v1 }
 0xf77   :  { %1037 = vrot.lane.b32.xlu0 %v1035_v8, %s1855_s6 }
 0xfbe   :  { %v1084_v26 = vpop.permute.xlu1 %1083 }
 0xfbf   :  { %v1086_v28 = vmul.f32 %v1084_v26, %v1067_v45 }
 0xfc1   :  { %1088 = vrot.lane.b32.xlu0 %v1086_v28, %s1854_s24 }
 0xfe9   :  { %v1038_v41 = vpop.permute.xlu0 %1037 }
 0xfea   :  { %v1040_v36 = vmul.f32 %v1038_v41, %v1021_v58 }
 0xfec   :  { %1042 = vrot.lane.b32.xlu2 %v1040_v36, %s1854_s24 }
0x1033   :  { %v1089_v20 = vpop.permute.xlu0 %1088 }
0x1034   :  { %v1091_v13 = vadd.f32 %v1682_v63, %v1089_v20 }
0x1036   :  { %v2312_v14 = vsel %vm1048_vm15, %v1091_v13, %v2254_v56  ;;  %v1113_v16 = vpack.c.bf16 %v1091_v13, %v1091_v13 }
0x1037   :  { %v1093_v17 = vpack.c.bf16 %v2312_v14, %v2312_v14 }
0x1038   :  { %1115 = vrot.lane.b32.xlu2 %v1113_v16, %s1852_s13 }
0x1039   :  { %1095 = vrot.lane.b32.xlu0 %v1093_v17, %s1852_s13 }
0x1046   :  { %v1043_v2 = vpop.permute.xlu2 %1042 }
0x1047   :  { %v2318_v18 = vadd.f32 %v1684_v1, %v1043_v2 }
0x1049   :  { %v2324_v19 = vsel %vm898_vm14, %v2318_v18, %v2266_v61 }
0x104a   :  { %v1133_v56 = vpack.c.bf16 %v2324_v19, %v2324_v19 }
0x104c   :  { %1135 = vrot.lane.b32.xlu1 %v1133_v56, %s1852_s13 }
0x1092   :  { %v1116_v21 = vpop.permute.xlu2 %1115 }
0x1093   :  { %1588 = vmatmul.msk.bf16.vlgmr.msrb.gmra.mxu2 %vm262_vm1, %v1116_v21 }
0x10ab   :  { %v1096_v23 = vpop.permute.xlu0 %1095 }
0x10ac   :  { %1587 = vmatmul.msk.bf16.vlgmr.msrb.gmra.mxu1 %vm262_vm1, %v1096_v23 }
0x10be   :  { %v1136_v25 = vpop.permute.xlu1 %1135 }
0x10bf   :  { %1589 = vmatmul.msk.bf16.vlgmr.msrb.gmra.mxu3 %vm262_vm1, %v1136_v25 }
0x1116   :  { %v1129_v27 = vpop.f32.mrf.mxu2 }
0x1117   :  { %v1130_v50 = vadd.f32 %v2341_v48, %v1129_v27 }
0x111e   :  { %v1131_v30 = vpop.f32.mrf.mxu2 }
0x1129   :  { %v1109_v6 = vpop.f32.mrf.mxu1 }
0x112a   :  { %v1219_v61 = vadd.f32 %v1109_v6, %v1999_v32  ;;  %v1199_v39 = vadd.f32 %v1109_v6, %v222_v38 }
0x112c   :  { %1221 = vrot.lane.b32.xlu2 %v1219_v61, %s1852_s13  ;;  %v1591_v12 = vmul.f32 -1.442695, %v1199_v39 }
0x112e   :  { %1685 = vpow2.f32 %v1591_v12 }
0x1131   :  { %v1111_v31 = vpop.f32.mrf.mxu1 }
0x1134   :  { %v1686_v40 = vpop.eup %1685 }
0x1135   :  { %v1203_v7 = vadd.f32 1.0, %v1686_v40 }
0x1137   :  { %1687 = vrcp.f32 %v1203_v7  ;;  %v1215_v47 = vand.u32 2147483648, %v1203_v7  ;;  %vm1209_vm4 = vweird.f32 %v1203_v7  ;;  %v1213_v15 = vand.u32 2147483647, %v1203_v7 }
0x1139   :  { %v1216_v51 = vor.u32 1.1754944e-38, %v1215_v47  ;;  %vm1214_vm6 = vcmp.eq.f32.partialorder %v1213_v15, 8.507059e+37 }
0x113d   :  { %v1688_v42 = vpop.eup %1687 }
0x113e   :  { %v1205_v35 = vmul.f32 %v1688_v42, %v1203_v7  ;;  %vm1210_vm2 = vweird.f32 %v1688_v42 }
0x113f   :  { %vm1211_vm5 = vmor %vm1209_vm4, %vm1210_vm2 }
0x1140   :  { %v1206_v43 = vsub.f32 1.0, %v1205_v35 }
0x1142   :  { %v1149_v9 = vpop.f32.mrf.mxu3  ;;  %v1207_v44 = vmul.f32 %v1688_v42, %v1206_v43 }
0x1143   :  { %v1173_v34 = vadd.f32 %v1149_v9, %v2064_v24  ;;  %v1153_v52 = vadd.f32 %v1149_v9, %v1130_v50 }
0x1144   :  { %v1208_v45 = vadd.f32 %v1688_v42, %v1207_v44 }
0x1145   :  { %1175 = vrot.lane.b32.xlu1 %v1173_v34, %s1852_s13  ;;  %v1590_v57 = vmul.f32 -1.442695, %v1153_v52 }
0x1146   :  { %v1212_v49 = vsel %vm1211_vm5, %v1688_v42, %v1208_v45 }
0x1147   :  { %v1217_v53 = vsel %vm1214_vm6, %v1216_v51, %v1212_v49  ;;  %1689 = vpow2.f32 %v1590_v57 }
0x114a   :  { %v1151_v37 = vpop.f32.mrf.mxu3 }
0x114d   :  { %v1690_v58 = vpop.eup %1689 }
0x114e   :  { %v1157_v59 = vadd.f32 1.0, %v1690_v58 }
0x1150   :  { %1691 = vrcp.f32 %v1157_v59  ;;  %v1169_v4 = vand.u32 2147483648, %v1157_v59  ;;  %vm1163_vm8 = vweird.f32 %v1157_v59  ;;  %v1167_v1 = vand.u32 2147483647, %v1157_v59 }
0x1152   :  { %v1170_v26 = vor.u32 1.1754944e-38, %v1169_v4  ;;  %vm1168_vm11 = vcmp.eq.f32.partialorder %v1167_v1, 8.507059e+37 }
0x1156   :  { %v1692_v62 = vpop.eup %1691 }
0x1157   :  { %v1159_v29 = vmul.f32 %v1692_v62, %v1157_v59  ;;  %vm1164_vm7 = vweird.f32 %v1692_v62 }
0x1158   :  { %vm1165_vm10 = vmor %vm1163_vm8, %vm1164_vm7 }
0x1159   :  { %v1160_v63 = vsub.f32 1.0, %v1159_v29 }
0x115b   :  { %v1161_v0 = vmul.f32 %v1692_v62, %v1160_v63 }
0x115d   :  { %v1162_v3 = vadd.f32 %v1692_v62, %v1161_v0 }
0x115f   :  { %v1166_v8 = vsel %vm1165_vm10, %v1692_v62, %v1162_v3 }
0x1160   :  { %v1171_v41 = vsel %vm1168_vm11, %v1170_v26, %v1166_v8 }
0x1186   :  { %v1222_v54 = vpop.permute.xlu2 %1221 }
0x1187   :  { %v1224_v55 = vmul.f32 %v1222_v54, %v1217_v53 }
0x1189   :  { %1226 = vrot.lane.b32.xlu1 %v1224_v55, %s1852_s13 }
0x11b7   :  { %v1176_v28 = vpop.permute.xlu1 %1175 }
0x11b8   :  { %v1178_v36 = vmul.f32 %v1176_v28, %v1171_v41 }
0x11ba   :  { %1180 = vrot.lane.b32.xlu0 %v1178_v36, %s1852_s13 }
0x11fb   :  { %v1227_v20 = vpop.permute.xlu1 %1226 }
0x11fc   :  { %v1229_v13 = vadd.f32 %v1227_v20, %v222_v38 }
0x11fe   :  { %1693 = vtanh.f32 %v1229_v13 }
0x1204   :  { %v1694_v16 = vpop.eup %1693 }
0x1205   :  { %v1231_v17 = vsub.f32 %v2312_v14, %v1694_v16 }
0x1207   :  { %1233 = vrot.lane.b32.xlu0 %v1231_v17, %s1855_s6 }
0x122c   :  { %v1181_v2 = vpop.permute.xlu0 %1180 }
0x122d   :  { %v1183_v56 = vadd.f32 %v1181_v2, %v1130_v50  ;;  %v224_v50 = vadd.f32 %v2296_v5, %v2289_v22 }
0x122f   :  { %1695 = vtanh.f32 %v1183_v56 }
0x1235   :  { %v1696_v21 = vpop.eup %1695 }
0x1236   :  { %v1185_v23 = vsub.f32 %v2324_v19, %v1696_v21 }
0x1238   :  { %1187 = vrot.lane.b32.xlu2 %v1185_v23, %s1855_s6 }
0x1279   :  { %v1234_v25 = vpop.permute.xlu0 %1233 }
0x127a   :  { %v1236_v27 = vmul.f32 %v1234_v25, %v1217_v53 }
0x127c   :  { %1238 = vrot.lane.b32.xlu2 %v1236_v27, %s1854_s24 }
0x1292   :  { %v1188_v30 = vpop.permute.xlu2 %1187 }
0x1293   :  { %v1190_v6 = vmul.f32 %v1188_v30, %v1171_v41 }
0x1295   :  { %1192 = vrot.lane.b32.xlu1 %v1190_v6, %s1854_s24 }
0x12d6   :  { %v1239_v61 = vpop.permute.xlu2 %1238 }
0x12d7   :  { %v1241_v31 = vadd.f32 %v1694_v16, %v1239_v61 }
0x12d9   :  { %v2356_v9 = vsel %vm1198_vm12, %v1241_v31, %v2312_v14  ;;  %v1263_v34 = vpack.c.bf16 %v1241_v31, %v1241_v31 }
0x12da   :  { %v1243_v37 = vpack.c.bf16 %v2356_v9, %v2356_v9 }
0x12db   :  { %1265 = vrot.lane.b32.xlu2 %v1263_v34, %s1852_s13 }
0x12dc   :  { %1245 = vrot.lane.b32.xlu1 %v1243_v37, %s1852_s13 }
0x1307   :  { %v1193_v38 = vpop.permute.xlu1 %1192 }
0x1308   :  { %v2362_v39 = vadd.f32 %v1696_v21, %v1193_v38 }
0x130a   :  { %v2368_v12 = vsel %vm1048_vm15, %v2362_v39, %v2324_v19 }
0x130b   :  { %v1283_v14 = vpack.c.bf16 %v2368_v12, %v2368_v12 }
0x130d   :  { %1285 = vrot.lane.b32.xlu0 %v1283_v14, %s1852_s13 }
0x1335   :  { %v1266_v40 = vpop.permute.xlu2 %1265 }
0x1336   :  { %1593 = vmatmul.msk.bf16.vlgmr.msra.gmra.mxu1 %vm262_vm1, %v1266_v40 }
0x134e   :  { %v1246_v7 = vpop.permute.xlu1 %1245 }
0x134f   :  { %1592 = vmatmul.msk.bf16.vlgmr.msra.gmra.mxu0 %vm262_vm1, %v1246_v7 }
0x137f   :  { %v1286_v42 = vpop.permute.xlu0 %1285 }
0x1380   :  { %1594 = vmatmul.msk.bf16.vlgmr.msra.gmra.mxu2 %vm262_vm1, %v1286_v42 }
0x13b3   :  { %v1279_v35 = vpop.f32.mrf.mxu1 }
0x13b4   :  { %v1280_v4 = vadd.f32 %v2341_v48, %v1279_v35 }
0x13bb   :  { %v1281_v43 = vpop.f32.mrf.mxu1 }
0x13cc   :  { %v1259_v44 = vpop.f32.mrf.mxu0 }
0x13cd   :  { %v1369_v19 = vadd.f32 %v1259_v44, %v1999_v32  ;;  %v1349_v51 = vadd.f32 %v1259_v44, %v224_v50 }
0x13cf   :  { %1371 = vrot.lane.b32.xlu1 %v1369_v19, %s1852_s13  ;;  %v1596_v52 = vmul.f32 -1.442695, %v1349_v51 }
0x13d1   :  { %1697 = vpow2.f32 %v1596_v52 }
0x13d4   :  { %v1261_v45 = vpop.f32.mrf.mxu0 }
0x13d7   :  { %v1698_v53 = vpop.eup %1697 }
0x13d8   :  { %v1353_v54 = vadd.f32 1.0, %v1698_v53 }
0x13da   :  { %1699 = vrcp.f32 %v1353_v54  ;;  %v1365_v62 = vand.u32 2147483648, %v1353_v54  ;;  %vm1359_vm4 = vweird.f32 %v1353_v54  ;;  %v1363_v29 = vand.u32 2147483647, %v1353_v54 }
0x13dc   :  { %v1366_v0 = vor.u32 1.1754944e-38, %v1365_v62  ;;  %vm1364_vm6 = vcmp.eq.f32.partialorder %v1363_v29, 8.507059e+37 }
0x13e0   :  { %v1700_v55 = vpop.eup %1699 }
0x13e1   :  { %v1355_v32 = vmul.f32 %v1700_v55, %v1353_v54  ;;  %vm1360_vm2 = vweird.f32 %v1700_v55 }
0x13e2   :  { %vm1361_vm5 = vmor %vm1359_vm4, %vm1360_vm2 }
0x13e3   :  { %v1356_v57 = vsub.f32 1.0, %v1355_v32 }
0x13e5   :  { %v1357_v58 = vmul.f32 %v1700_v55, %v1356_v57 }
0x13e7   :  { %v1358_v59 = vadd.f32 %v1700_v55, %v1357_v58 }
0x13e9   :  { %v1362_v63 = vsel %vm1361_vm5, %v1700_v55, %v1358_v59 }
0x13ea   :  { %v1367_v5 = vsel %vm1364_vm6, %v1366_v0, %v1362_v63 }
0x1403   :  { %v1299_v47 = vpop.f32.mrf.mxu2 }
0x1404   :  { %v1323_v15 = vadd.f32 %v1299_v47, %v2064_v24  ;;  %v1303_v1 = vadd.f32 %v1299_v47, %v1280_v4 }
0x1406   :  { %1325 = vrot.lane.b32.xlu0 %v1323_v15, %s1852_s13  ;;  %v1595_v8 = vmul.f32 -1.442695, %v1303_v1 }
0x1408   :  { %1701 = vpow2.f32 %v1595_v8 }
0x140b   :  { %v1301_v49 = vpop.f32.mrf.mxu2 }
0x140e   :  { %v1702_v26 = vpop.eup %1701 }
0x140f   :  { %v1307_v28 = vadd.f32 1.0, %v1702_v26 }
0x1411   :  { %1703 = vrcp.f32 %v1307_v28  ;;  %v1319_v17 = vand.u32 2147483648, %v1307_v28  ;;  %vm1313_vm8 = vweird.f32 %v1307_v28  ;;  %v1317_v2 = vand.u32 2147483647, %v1307_v28 }
0x1413   :  { %v1320_v21 = vor.u32 1.1754944e-38, %v1319_v17  ;;  %vm1318_vm11 = vcmp.eq.f32.partialorder %v1317_v2, 8.507059e+37  ;;  %v597_v2 = vsel %vm448_vm3, %v2155_v11, 0.0  ;;  %v1047_v11 = vsel %vm898_vm14, %v2318_v18, 0.0 }
0x1414   :  { %vm1505_vm3 = vcmask 785408  }
0x1417   :  { %v1704_v41 = vpop.eup %1703 }
0x1418   :  { %v1309_v36 = vmul.f32 %v1704_v41, %v1307_v28  ;;  %vm1314_vm7 = vweird.f32 %v1704_v41  ;;  %v447_v28 = vsel %vm279_vm9, %v2107_v46, 0.0  ;;  %vm1503_vm9 = vcmask 523264  }
0x1419   :  { %vm1315_vm10 = vmor %vm1313_vm8, %vm1314_vm7  ;;  %vm1348_vm7 = vcmp.gt.s32.totalorder %v2042_v10, 7 }
0x141a   :  { %v1310_v20 = vsub.f32 1.0, %v1309_v36 }
0x141c   :  { %v1311_v13 = vmul.f32 %v1704_v41, %v1310_v20 }
0x141e   :  { %v1312_v16 = vadd.f32 %v1704_v41, %v1311_v13 }
0x1420   :  { %v1316_v56 = vsel %vm1315_vm10, %v1704_v41, %v1312_v16  ;;  %v1197_v41 = vsel %vm1048_vm15, %v2362_v39, 0.0 }
0x1421   :  { %v1321_v25 = vsel %vm1318_vm11, %v1320_v21, %v1316_v56 }
0x1441   :  { %v1372_v22 = vpop.permute.xlu1 %1371 }
0x1442   :  { %v1374_v3 = vmul.f32 %v1372_v22, %v1367_v5 }
0x1444   :  { %1376 = vrot.lane.b32.xlu0 %v1374_v3, %s1852_s13 }
0x1478   :  { %v1326_v23 = vpop.permute.xlu0 %1325 }
0x1479   :  { %v1328_v27 = vmul.f32 %v1326_v23, %v1321_v25 }
0x147b   :  { %1330 = vrot.lane.b32.xlu2 %v1328_v27, %s1852_s13 }
0x14b6   :  { %v1377_v30 = vpop.permute.xlu0 %1376 }
0x14b7   :  { %v1379_v6 = vadd.f32 %v1377_v30, %v224_v50 }
0x14b9   :  { %1705 = vtanh.f32 %v1379_v6 }
0x14bf   :  { %v1706_v61 = vpop.eup %1705 }
0x14c0   :  { %v1381_v31 = vsub.f32 %v2356_v9, %v1706_v61 }
0x14c2   :  { %1383 = vrot.lane.b32.xlu2 %v1381_v31, %s1855_s6 }
0x14d5   :  { %v1331_v34 = vpop.permute.xlu2 %1330 }
0x14d6   :  { %v1333_v37 = vadd.f32 %v1331_v34, %v1280_v4 }
0x14d8   :  { %1707 = vtanh.f32 %v1333_v37 }
0x14de   :  { %v1708_v38 = vpop.eup %1707 }
0x14df   :  { %v1335_v14 = vsub.f32 %v2368_v12, %v1708_v38 }
0x14e1   :  { %1337 = vrot.lane.b32.xlu1 %v1335_v14, %s1855_s6 }
0x151c   :  { %v1384_v40 = vpop.permute.xlu2 %1383 }
0x151d   :  { %v1386_v7 = vmul.f32 %v1384_v40, %v1367_v5 }
0x151f   :  { %1388 = vrot.lane.b32.xlu1 %v1386_v7, %s1854_s24 }
0x1553   :  { %v1338_v42 = vpop.permute.xlu1 %1337 }
0x1554   :  { %v1340_v35 = vmul.f32 %v1338_v42, %v1321_v25 }
0x1556   :  { %1342 = vrot.lane.b32.xlu0 %v1340_v35, %s1854_s24 }
0x1591   :  { %v1389_v43 = vpop.permute.xlu1 %1388 }
0x1592   :  { %v1391_v44 = vadd.f32 %v1706_v61, %v1389_v43 }
0x1594   :  { %v1393_v19 = vpack.c.bf16 %v1391_v44, %v1391_v44  ;;  %v1392_v36 = vsel %vm1348_vm7, %v1391_v44, %v2356_v9  ;;  %v897_v9 = vsel %vm748_vm13, %v2260_v60, 0.0  ;;  %v747_v60 = vsel %vm598_vm0, %v2202_v33, 0.0 }
0x1596   :  { %1395 = vrot.lane.b32.xlu0 %v1393_v19, %s1852_s13 }
0x15c8   :  { %v1343_v45 = vpop.permute.xlu0 %1342 }
0x15c9   :  { %v2392_v47 = vadd.f32 %v1708_v38, %v1343_v45 }
0x15cb   :  { %v2398_v15 = vsel %vm1198_vm12, %v2392_v47, %v2368_v12  ;;  %v1347_v14 = vsel %vm1198_vm12, %v2392_v47, 0.0 }
0x15cc   :  { %v1413_v49 = vpack.c.bf16 %v2398_v15, %v2398_v15 }
0x15ce   :  { %1415 = vrot.lane.b32.xlu2 %v1413_v49, %s1852_s13 }
0x1608   :  { %v1396_v50 = vpop.permute.xlu0 %1395 }
0x1609   :  { %1597 = vmatmul.msk.bf16.vlgmr.msra.gmra.mxu3 %vm262_vm1, %v1396_v50 }
0x1628   :  { %v1416_v51 = vpop.permute.xlu2 %1415 }
0x1629   :  { %1598 = vmatmul.msk.bf16.vlgmr.msrb.gmra.mxu0 %vm262_vm1, %v1416_v51 }
0x168c   :  { %v1409_v52 = vpop.f32.mrf.mxu3 }
0x168d   :  { %v1410_v32 = vadd.f32 %v2341_v48, %v1409_v52 }
0x1694   :  { %v1411_v53 = vpop.f32.mrf.mxu3 }
0x16a6   :  { %v1429_v54 = vpop.f32.mrf.mxu0 }
0x16a7   :  { %v1453_v55 = vadd.f32 %v1429_v54, %v2064_v24  ;;  %v1433_v57 = vadd.f32 %v1429_v54, %v1410_v32 }
0x16a9   :  { %1455 = vrot.lane.b32.xlu1 %v1453_v55, %s1852_s13  ;;  %v1599_v58 = vmul.f32 -1.442695, %v1433_v57 }
0x16ab   :  { %1709 = vpow2.f32 %v1599_v58 }
0x16ae   :  { %v1431_v12 = vpop.f32.mrf.mxu0 }
0x16b1   :  { %v1710_v59 = vpop.eup %1709 }
0x16b2   :  { %v1437_v62 = vadd.f32 1.0, %v1710_v59 }
0x16b4   :  { %1711 = vrcp.f32 %v1437_v62  ;;  %v1449_v3 = vand.u32 2147483648, %v1437_v62  ;;  %vm1443_vm4 = vweird.f32 %v1437_v62  ;;  %v1447_v24 = vand.u32 2147483647, %v1437_v62 }
0x16b6   :  { %v1450_v1 = vor.u32 1.1754944e-38, %v1449_v3  ;;  %vm1448_vm6 = vcmp.eq.f32.partialorder %v1447_v24, 8.507059e+37 }
0x16ba   :  { %v1712_v29 = vpop.eup %1711 }
0x16bb   :  { %v1439_v63 = vmul.f32 %v1712_v29, %v1437_v62  ;;  %vm1444_vm2 = vweird.f32 %v1712_v29 }
0x16bc   :  { %vm1445_vm5 = vmor %vm1443_vm4, %vm1444_vm2 }
0x16bd   :  { %v1440_v0 = vsub.f32 1.0, %v1439_v63 }
0x16bf   :  { %v1441_v22 = vmul.f32 %v1712_v29, %v1440_v0 }
0x16c1   :  { %v1442_v5 = vadd.f32 %v1712_v29, %v1441_v22 }
0x16c3   :  { %v1446_v4 = vsel %vm1445_vm5, %v1712_v29, %v1442_v5 }
0x16c4   :  { %v1451_v8 = vsel %vm1448_vm6, %v1450_v1, %v1446_v4 }
0x171b   :  { %v1456_v48 = vpop.permute.xlu1 %1455 }
0x171c   :  { %v1458_v26 = vmul.f32 %v1456_v48, %v1451_v8 }
0x171e   :  { %1460 = vrot.lane.b32.xlu2 %v1458_v26, %s1852_s13 }
0x1726   :  { %1479 = vrot.lane.b32.xlu2 %v447_v28, %s1852_s13 }
0x172e   :  { %1495 = vrot.lane.b32.xlu2 %v1197_v41, %s1855_s6 }
0x1736   :  { %1514 = vrot.lane.b32.xlu2 %v1392_v36, %s1852_s13 }
0x1778   :  { %v1461_v20 = vpop.permute.xlu2 %1460 }
0x1779   :  { %v1463_v13 = vadd.f32 %v1461_v20, %v1410_v32 }
0x177b   :  { %1713 = vtanh.f32 %v1463_v13 }
0x1780   :  { %v1480_v46 = vpop.permute.xlu2 %1479 }
0x1781   :  { %v1714_v16 = vpop.eup %1713 }
0x1782   :  { %v1465_v17 = vsub.f32 %v2398_v15, %v1714_v16 }
0x1784   :  { %1467 = vrot.lane.b32.xlu0 %v1465_v17, %s1855_s6 }
0x1788   :  { %v1496_v39 = vpop.permute.xlu2 %1495 }
0x178c   :  { %1483 = vrot.lane.b32.xlu0 %v597_v2, %s1855_s6 }
0x1790   :  { %v1515_v56 = vpop.permute.xlu2 %1514 }
0x1791   :  { %1520 = vst.msk [vmem:[#allocation10] sm:$0xff] %vm262_vm1, %v1515_v56 }
0x1794   :  { %1487 = vrot.lane.b32.xlu0 %v897_v9, %s1854_s24 }
0x17f6   :  { %v1468_v21 = vpop.permute.xlu0 %1467 }
0x17f7   :  { %v1470_v23 = vmul.f32 %v1468_v21, %v1451_v8 }
0x17f9   :  { %1472 = vrot.lane.b32.xlu1 %v1470_v23, %s1854_s24 }
0x17fe   :  { %v1484_v25 = vpop.permute.xlu0 %1483 }
0x17ff   :  { %v1502_v27 = vsel %vm262_vm1, %v1480_v46, %v1484_v25 }
0x1800   :  { %v1504_v6 = vsel %vm1503_vm9, %v1502_v27, %v747_v60 }
0x1801   :  { %1491 = vrot.lane.b32.xlu1 %v1047_v11, %s1852_s13 }
0x1806   :  { %v1488_v30 = vpop.permute.xlu0 %1487 }
0x1807   :  { %v1506_v61 = vsel %vm1505_vm3, %v1504_v6, %v1488_v30 }
0x1808   :  { %1510 = vst [vmem:[%s2481_s11] sm:$0xff] %v1506_v61 }
0x186b   :  { %v1473_v18 = vpop.permute.xlu1 %1472 }
0x186c   :  { %v1475_v31 = vadd.f32 %v1714_v16, %v1473_v18 }
0x186e   :  { %v1477_v34 = vsel %vm1348_vm7, %v1475_v31, 0.0  ;;  %v1476_v37 = vsel %vm1348_vm7, %v1475_v31, %v2398_v15 }
0x186f   :  { %1499 = vrot.lane.b32.xlu1 %v1477_v34, %s1854_s24  ;;  %1516 = vrot.lane.b32.xlu0 %v1476_v37, %s1852_s13 }
0x1873   :  { %v1492_v33 = vpop.permute.xlu1 %1491 }
0x1874   :  { %v1507_v38 = vsel %vm262_vm1, %v1492_v33, %v1496_v39 }
0x1875   :  { %v1508_v7 = vsel %vm1503_vm9, %v1507_v38, %v1347_v14 }
0x18e1   :  { %v1500_v40 = vpop.permute.xlu1 %1499  ;;  %v1517_v42 = vpop.permute.xlu0 %1516 }
0x18e2   :  { %v1509_v35 = vsel %vm1505_vm3, %v1508_v7, %v1500_v40  ;;  %1521 = vst.msk [vmem:[#allocation10 + $0x8] sm:$0xff] %vm262_vm1, %v1517_v42 }
0x18e3   :  { %1511 = vst [vmem:[%s2481_s11 + $0x8] sm:$0xff] %v1509_v35 }
0x18e4   :  { %1536 = dma.vmem_to_hbm [thread:$0]  %s1529_s26, 256, %s1531_s1, [#allocation4], %s1846_s29, %s1846_s29, %s1847_s30  }
0x18e5   :  { %1843 = dma.done.wait [#allocation4], 256  }
0x18e6   :  { %1844 = vsyncadd [#allocation4], 4294967040 }
0x18e7   :  { %1543 = vsyncpa [#allocation3], 1 }
0x18e8   :  { %1544 = vsyncpa [#allocation6], 1 }
0x18e9   :  { %1545 = vsyncpa [#allocation9], 1 }
0x18ea   :  { %1546 = vsyncpa [#allocation4], 1 }

</bundles_post_ra>
